<compile_context>
chip_gen: v6e
topology: v6e:2x2x1
jax: 0.10.0
libtpu: 0.0.40
codegen_flags: <defaults>
</compile_context>

<pallas_src>
import functools

import jax
import jax.numpy as jnp
from jax.experimental import pallas as pl
from jax.experimental.pallas import tpu as pltpu

_LANE = 128
_SUBLANE = 8
_X_TILE_BYTES_CAP = 4 * 1024 * 1024   # per-buffer cap on the pipelined x tile


def _channel_attn_kernel(x_ref, w1_ref, b1_ref, w2_ref, b2_ref, o_ref,
                         acc_ref, h_ref, *,
                         block_c, tile_hw, hw, inv_hw, mask_from_chunk):
    """Grid = (B, C//block_c, cdiv(hw, tile_hw)); ("parallel","arbitrary","arbitrary").

    x_ref  : (1, block_c, tile_hw)   activation tile of the current batch row
    w1_ref : (C, mid_pad)            conv1 weight, resident
    b1_ref : (1, mid_pad)  w2_ref: (mid_pad, C)  b2_ref: (1, C)
    o_ref  : (1, 1, C)               sigmoid gate for the current batch row
    acc_ref: (1, block_c, 128) f32   lane-wide pooling accumulator (per (b, c-block))
    h_ref  : (1, mid_pad)   f32      conv1 pre-activation accumulator (per batch row)
    """
    c = pl.program_id(1)
    k = pl.program_id(2)
    n_c = pl.num_programs(1)
    n_hw = pl.num_programs(2)

    n_full = tile_hw // _LANE       # aligned 128-lane chunks in this tile
    rem = tile_hw % _LANE           # nonzero only when tile_hw == hw (single hw step)

    if n_full > 0:
        @pl.when(k == 0)
        def _init_acc():
            acc_ref[...] = jnp.zeros_like(acc_ref)

    @pl.when((c == 0) & (k == 0))
    def _init_h():
        h_ref[...] = jnp.zeros_like(h_ref)

    # Steady state: stream aligned 128-lane chunks straight from the ref and
    # accumulate with VPU adds (no whole-tile materialisation, no per-chunk
    # cross-lane reduce); this stays hidden under the x-tile DMA stream.
    for j in range(n_full):                      # static unroll (bounded by tile cap)
        chunk = x_ref[:, :, pl.ds(j * _LANE, _LANE)].astype(jnp.float32)
        if j >= mask_from_chunk:
            # Chunk can straddle / exceed the true spatial extent on the ragged
            # tail grid step: mask by global element index (a no-op on earlier
            # steps) instead of ever padding x in HBM.
            lane = jax.lax.broadcasted_iota(jnp.int32, chunk.shape, 2)
            valid = (k * tile_hw + j * _LANE + lane) < hw
            chunk = jnp.where(valid, chunk, 0.0)
        acc_ref[...] += chunk

    # Per-(batch, channel-block) epilogue: one cross-lane reduce plus a partial
    # conv1 matmul (conv1 is linear in channels, so channel blocks accumulate).
    @pl.when(k == n_hw - 1)
    def _reduce_block():
        if n_full > 0:
            pooled = jnp.sum(acc_ref[...], axis=-1)              # (1, block_c)
        else:
            pooled = jnp.zeros((1, block_c), jnp.float32)
        if rem:
            # tile_hw == hw here, so these are exactly the trailing valid
            # elements of the (unpadded) spatial axis.
            tail = x_ref[:, :, pl.ds(n_full * _LANE, rem)].astype(jnp.float32)
            pooled = pooled + jnp.sum(tail, axis=-1)
        pooled = pooled * inv_hw                                  # true mean
        row0 = pl.multiple_of(c * block_c, _SUBLANE)
        w1_blk = w1_ref[pl.ds(row0, block_c), :]                  # (block_c, mid_pad)
        # NOTE: for bf16 weights the pooled mean is fed to the MXU in bf16;
        # tiny precision loss vs. an f32 1x1 conv, fine for an SE gate.
        h_ref[...] += jnp.dot(pooled.astype(w1_blk.dtype), w1_blk,
                              preferred_element_type=jnp.float32)

    # Final epilogue (once per batch row): finish the bottleneck MLP + sigmoid.
    @pl.when((c == n_c - 1) & (k == n_hw - 1))
    def _finalize():
        h = jnp.maximum(h_ref[...] + b1_ref[...].astype(jnp.float32), 0.0)
        y = jnp.dot(h.astype(w2_ref.dtype), w2_ref[...],
                    preferred_element_type=jnp.float32)
        y = y + b2_ref[...].astype(jnp.float32)                   # (1, C)
        o_ref[...] = jax.nn.sigmoid(y).astype(o_ref.dtype).reshape(o_ref.shape)


def _vmem_capacity_bytes():
    try:
        return int(pltpu.get_tpu_info().vmem_capacity_bytes)
    except Exception:
        return 64 * 1024 * 1024     # conservative fallback (v7x per-TC VMEM)


def _c_block_candidates(C):
    cands = {d for d in range(_SUBLANE, C + 1, _SUBLANE) if C % d == 0}
    cands.add(C)
    return sorted(cands, reverse=True)


def _choose_blocks(C, hw, x_itemsize, fixed_bytes, budget):
    """Prefer the full spatial extent per block (contiguous block_c*hw DMA runs,
    no tail masking) with the largest channel block that fits both the VMEM
    budget and the per-buffer tile cap; huge HxW falls back to 128-multiple
    spatial tiles (masked cdiv tail, never a host-side pad of x)."""
    cands = _c_block_candidates(C)
    for c_blk in cands:
        tile_bytes = c_blk * hw * x_itemsize
        acc_bytes = c_blk * _LANE * 4
        if (tile_bytes <= _X_TILE_BYTES_CAP
                and fixed_bytes + acc_bytes + 2 * tile_bytes <= budget):
            return c_blk, hw
    c_blk = cands[-1]                       # smallest sublane-aligned channel block
    acc_bytes = c_blk * _LANE * 4
    avail = min(_X_TILE_BYTES_CAP, max(budget - fixed_bytes - acc_bytes, 0) // 2)
    t = avail // (c_blk * x_itemsize)
    t = max(_LANE, (t // _LANE) * _LANE)
    return c_blk, int(min(t, hw))


def channel_attn(x, w1, b1, w2, b2, *, block_c=None, tile_hw=None):
    """SE channel attention: sigmoid(conv2(relu(conv1(avg_pool2d(x, HxW))))).

    x:  (B, C, H, W) NCHW activations.
    w1: (C, mid)  == torch conv1.weight[:, :, 0, 0].T        b1: (mid,)
    w2: (mid, C)  == torch conv2.weight[:, :, 0, 0].T        b2: (C,)
    Returns the (B, C, 1, 1) channel gate.
    """
    B, C, H, W = x.shape
    hw = H * W
    mid = w1.shape[1]
    assert w1.shape == (C, mid) and w2.shape == (mid, C)
    assert b1.shape == (mid,) and b2.shape == (C,)

    # Free re-layout of contiguous NCHW; NO spatial padding/copy of x in HBM.
    x_flat = x.reshape(B, C, hw)

    # Lane-dense bottleneck: zero-pad `mid` up to a multiple of 128.  This is
    # mathematically inert ONLY because the padded w1 columns / b1 entries AND
    # the padded w2 rows are all zero (relu(0 + 0) * 0 == 0) -- keep it so.
    mid_pad = pl.cdiv(mid, _LANE) * _LANE
    if mid_pad != mid:
        w1 = jnp.zeros((C, mid_pad), w1.dtype).at[:, :mid].set(w1)
        b1 = jnp.zeros((mid_pad,), b1.dtype).at[:mid].set(b1)
        w2 = jnp.zeros((mid_pad, C), w2.dtype).at[:mid, :].set(w2)
    b1_2d = b1.reshape(1, mid_pad)
    b2_2d = b2.reshape(1, C)

    x_itemsize = jnp.dtype(x.dtype).itemsize
    w_itemsize = jnp.dtype(w1.dtype).itemsize
    # Resident (single-buffered) weights/biases + the per-batch bottleneck
    # accumulator + the double-buffered output row.
    fixed_bytes = ((C * mid_pad + mid_pad + mid_pad * C + C) * w_itemsize
                   + mid_pad * 4 + 2 * C * x_itemsize)

    vmem_cap = _vmem_capacity_bytes()
    budget = int(min(vmem_cap, 128 * 1024 * 1024) * 0.7)

    auto_c, auto_hw = _choose_blocks(C, hw, x_itemsize, fixed_bytes, budget)
    block_c = auto_c if block_c is None else min(block_c, C)
    tile_hw = auto_hw if tile_hw is None else min(tile_hw, hw)

    assert C % block_c == 0, "block_c must divide C"
    assert block_c % _SUBLANE == 0 or block_c == C, "block_c must be sublane-aligned"
    n_c = C // block_c
    n_hw = pl.cdiv(hw, tile_hw)
    if n_hw > 1:
        assert tile_hw % _LANE == 0, "spatial tiles must be 128-lane multiples"

    # Static tail-masking plan for the ragged last spatial tile.
    n_full = tile_hw // _LANE
    if n_hw == 1:
        mask_from_chunk = n_full            # the block covers the exact extent
    else:
        tail_len = hw - (n_hw - 1) * tile_hw
        mask_from_chunk = n_full if tail_len == tile_hw else tail_len // _LANE

    # Scoped VMEM sized to actual need (+~25% headroom), not a flat fraction.
    need = fixed_bytes + block_c * _LANE * 4 + 2 * block_c * tile_hw * x_itemsize
    vmem_limit = int(min(vmem_cap, max(4 << 20, need + need // 4 + (2 << 20))))

    kernel = functools.partial(
        _channel_attn_kernel,
        block_c=block_c, tile_hw=tile_hw, hw=hw,
        inv_hw=1.0 / float(hw), mask_from_chunk=mask_from_chunk)

    def build(single_buffer_weights):
        if single_buffer_weights:
            def resident(shape):
                return pl.BlockSpec(shape, lambda b, c, k: (0, 0),
                                    pipeline_mode=pl.Buffered(1))
        else:
            def resident(shape):
                return pl.BlockSpec(shape, lambda b, c, k: (0, 0))
        grid_spec = pltpu.PrefetchScalarGridSpec(
            num_scalar_prefetch=0,
            grid=(B, n_c, n_hw),
            in_specs=[
                pl.BlockSpec((1, block_c, tile_hw), lambda b, c, k: (b, c, k)),
                resident((C, mid_pad)),          # w1 (resident)
                resident((1, mid_pad)),          # b1
                resident((mid_pad, C)),          # w2
                resident((1, C)),                # b2
            ],
            out_specs=pl.BlockSpec((1, 1, C), lambda b, c, k: (b, 0, 0)),
            scratch_shapes=[
                pltpu.VMEM((1, block_c, _LANE), jnp.float32),   # pooling accumulator
                pltpu.VMEM((1, mid_pad), jnp.float32),          # conv1 accumulator
            ],
        )
        return pl.pallas_call(
            kernel,
            out_shape=jax.ShapeDtypeStruct((B, 1, C), x.dtype),
            grid_spec=grid_spec,
            compiler_params=pltpu.CompilerParams(
                dimension_semantics=("parallel", "arbitrary", "arbitrary"),
                vmem_limit_bytes=vmem_limit,
            ),
        )

    try:
        # Constant-index weights: fetch once, keep a single VMEM copy.
        out = build(True)(x_flat, w1, b1_2d, w2, b2_2d)
    except Exception:
        # Fallback for Pallas builds without per-operand pipeline_mode support.
        out = build(False)(x_flat, w1, b1_2d, w2, b2_2d)

    return out.reshape(B, C, 1, 1)


def _reference(x, w1, b1, w2, b2):
    pooled = jnp.mean(x.astype(jnp.float32), axis=(2, 3))
    h = jnp.maximum(pooled @ w1.astype(jnp.float32) + b1.astype(jnp.float32), 0.0)
    y = h @ w2.astype(jnp.float32) + b2.astype(jnp.float32)
    return jax.nn.sigmoid(y).reshape(x.shape[0], x.shape[1], 1, 1)


if __name__ == "__main__":
    # Small shapes consistent with the module: in_channels % reduction_rate == 0.
    # H*W = 400 = 3*128 + 16 exercises the sub-128 remainder (and, when forced
    # below, the ragged cdiv tail) without ever padding x in HBM.
    B, C, H, W = 2, 64, 20, 20
    reduction_rate = 16
    mid = C // reduction_rate

    key = jax.random.PRNGKey(0)
    k_x, k_w1, k_b1, k_w2, k_b2 = jax.random.split(key, 5)
    x = jax.random.normal(k_x, (B, C, H, W), dtype=jnp.float32)
    # torch conv1.weight is (mid, C, 1, 1); stored transposed as (C, mid) so the
    # 1x1 conv on the pooled vector is pooled(B, C) @ w1.
    w1 = 0.1 * jax.random.normal(k_w1, (C, mid), dtype=jnp.float32)
    b1 = 0.1 * jax.random.normal(k_b1, (mid,), dtype=jnp.float32)
    w2 = 0.1 * jax.random.normal(k_w2, (mid, C), dtype=jnp.float32)
    b2 = 0.1 * jax.random.normal(k_b2, (C,), dtype=jnp.float32)

    ref = _reference(x, w1, b1, w2, b2)

    # 1) Auto tiling: single grid step per (batch, channel-block) with the full
    #    spatial extent (contiguous DMA) -- the common SE regime.
    out = jax.block_until_ready(channel_attn(x, w1, b1, w2, b2))
    assert out.shape == (B, C, 1, 1)
    assert jnp.allclose(out, ref, atol=1e-5, rtol=1e-5), float(
        jnp.max(jnp.abs(out - ref)))

    # 2) Forced small tiles: multiple channel blocks + a cdiv spatial grid with
    #    in-kernel masking of the ragged tail (400 -> 4 tiles of 128).
    out2 = jax.block_until_ready(
        channel_attn(x, w1, b1, w2, b2, block_c=32, tile_hw=128))
    assert jnp.allclose(out2, ref, atol=1e-5, rtol=1e-5), float(
        jnp.max(jnp.abs(out2 - ref)))

    # 3) bf16 activations/weights (gate stays well within bf16 tolerance of the
    #    f32 reference).
    bf = jnp.bfloat16
    out3 = jax.block_until_ready(
        channel_attn(x.astype(bf), w1.astype(bf), b1.astype(bf),
                     w2.astype(bf), b2.astype(bf)))
    assert jnp.allclose(out3.astype(jnp.float32), ref, atol=5e-2), float(
        jnp.max(jnp.abs(out3.astype(jnp.float32) - ref)))

    print("KERNEL_OK")
</pallas_src>

<mosaic_0001>
module attributes {stable_mosaic.version = 11 : i64} {
  func.func @_channel_attn_kernel(%arg0: i32, %arg1: i32, %arg2: i32, %arg3: memref<1x64x400xf32, #tpu.memory_space<vmem>>, %arg4: memref<64x128xf32, #tpu.memory_space<vmem>>, %arg5: memref<1x128xf32, #tpu.memory_space<vmem>>, %arg6: memref<128x64xf32, #tpu.memory_space<vmem>>, %arg7: memref<1x64xf32, #tpu.memory_space<vmem>>, %arg8: memref<1x1x64xf32, #tpu.memory_space<vmem>>, %arg9: memref<1x64x128xf32, #tpu.memory_space<vmem>>, %arg10: memref<1x128xf32, #tpu.memory_space<vmem>>) attributes {dimension_semantics = [#tpu.dimension_semantics<parallel>, #tpu.dimension_semantics<arbitrary>, #tpu.dimension_semantics<arbitrary>], iteration_bounds = array<i64: 2, 1, 1>, scalar_prefetch = 0 : i64, scratch_operands = 2 : i64, tpu.core_type = #tpu.core_type<tc>, window_params = [{transform_indices = @transform_0, window_bounds = array<i64: 1, 64, 400>}, {pipeline_mode = #tpu.pipeline_mode<synchronous>, transform_indices = @transform_1, window_bounds = array<i64: 64, 128>}, {pipeline_mode = #tpu.pipeline_mode<synchronous>, transform_indices = @transform_2, window_bounds = array<i64: 1, 128>}, {pipeline_mode = #tpu.pipeline_mode<synchronous>, transform_indices = @transform_3, window_bounds = array<i64: 128, 64>}, {pipeline_mode = #tpu.pipeline_mode<synchronous>, transform_indices = @transform_4, window_bounds = array<i64: 1, 64>}, {transform_indices = @transform_5, window_bounds = array<i64: 1, 1, 64>}]} {
    %c0_i32 = arith.constant 0 : i32
    %0 = arith.cmpi eq, %arg2, %c0_i32 : i32
    %1 = arith.extui %0 : i1 to i32
    %c0_i32_0 = arith.constant 0 : i32
    %2 = arith.cmpi ne, %1, %c0_i32_0 : i32
    scf.if %2 {
      %cst = arith.constant 0.000000e+00 : f32
      %28 = vector.broadcast %cst : f32 to vector<1x64x128xf32>
      %c0_33 = arith.constant 0 : index
      %c0_34 = arith.constant 0 : index
      %c0_35 = arith.constant 0 : index
      %29 = vector.load %arg9[%c0_33, %c0_34, %c0_35] : memref<1x64x128xf32, #tpu.memory_space<vmem>>, vector<1x64x128xf32>
      tpu.vector_store %arg9[%c0_33, %c0_34, %c0_35], %28 {strides = array<i32>} : memref<1x64x128xf32, #tpu.memory_space<vmem>>, vector<1x64x128xf32>,
    } else {
    }
    %c0_i32_1 = arith.constant 0 : i32
    %3 = arith.cmpi eq, %arg1, %c0_i32_1 : i32
    %c0_i32_2 = arith.constant 0 : i32
    %4 = arith.cmpi eq, %arg2, %c0_i32_2 : i32
    %5 = arith.andi %3, %4 : i1
    %6 = arith.extui %5 : i1 to i32
    %c0_i32_3 = arith.constant 0 : i32
    %7 = arith.cmpi ne, %6, %c0_i32_3 : i32
    scf.if %7 {
      %cst = arith.constant 0.000000e+00 : f32
      %28 = vector.broadcast %cst : f32 to vector<1x128xf32>
      %c0_33 = arith.constant 0 : index
      %c0_34 = arith.constant 0 : index
      %29 = vector.load %arg10[%c0_33, %c0_34] : memref<1x128xf32, #tpu.memory_space<vmem>>, vector<1x128xf32>
      tpu.vector_store %arg10[%c0_33, %c0_34], %28 {strides = array<i32>} : memref<1x128xf32, #tpu.memory_space<vmem>>, vector<1x128xf32>,
    } else {
    }
    %c0 = arith.constant 0 : index
    %c0_4 = arith.constant 0 : index
    %c0_5 = arith.constant 0 : index
    %8 = vector.load %arg3[%c0, %c0_4, %c0_5] : memref<1x64x400xf32, #tpu.memory_space<vmem>>, vector<1x64x128xf32>
    %c0_6 = arith.constant 0 : index
    %c0_7 = arith.constant 0 : index
    %c0_8 = arith.constant 0 : index
    %9 = vector.load %arg9[%c0_6, %c0_7, %c0_8] : memref<1x64x128xf32, #tpu.memory_space<vmem>>, vector<1x64x128xf32>
    %10 = arith.addf %9, %8 : vector<1x64x128xf32>
    %c0_9 = arith.constant 0 : index
    %c0_10 = arith.constant 0 : index
    %c0_11 = arith.constant 0 : index
    %11 = vector.load %arg9[%c0_9, %c0_10, %c0_11] : memref<1x64x128xf32, #tpu.memory_space<vmem>>, vector<1x64x128xf32>
    tpu.vector_store %arg9[%c0_9, %c0_10, %c0_11], %10 {strides = array<i32>} : memref<1x64x128xf32, #tpu.memory_space<vmem>>, vector<1x64x128xf32>,
    %c0_12 = arith.constant 0 : index
    %c0_13 = arith.constant 0 : index
    %c128 = arith.constant 128 : index
    %12 = vector.load %arg3[%c0_12, %c0_13, %c128] : memref<1x64x400xf32, #tpu.memory_space<vmem>>, vector<1x64x128xf32>
    %c0_14 = arith.constant 0 : index
    %c0_15 = arith.constant 0 : index
    %c0_16 = arith.constant 0 : index
    %13 = vector.load %arg9[%c0_14, %c0_15, %c0_16] : memref<1x64x128xf32, #tpu.memory_space<vmem>>, vector<1x64x128xf32>
    %14 = arith.addf %13, %12 : vector<1x64x128xf32>
    %c0_17 = arith.constant 0 : index
    %c0_18 = arith.constant 0 : index
    %c0_19 = arith.constant 0 : index
    %15 = vector.load %arg9[%c0_17, %c0_18, %c0_19] : memref<1x64x128xf32, #tpu.memory_space<vmem>>, vector<1x64x128xf32>
    tpu.vector_store %arg9[%c0_17, %c0_18, %c0_19], %14 {strides = array<i32>} : memref<1x64x128xf32, #tpu.memory_space<vmem>>, vector<1x64x128xf32>,
    %c0_20 = arith.constant 0 : index
    %c0_21 = arith.constant 0 : index
    %c256 = arith.constant 256 : index
    %16 = vector.load %arg3[%c0_20, %c0_21, %c256] : memref<1x64x400xf32, #tpu.memory_space<vmem>>, vector<1x64x128xf32>
    %c0_22 = arith.constant 0 : index
    %c0_23 = arith.constant 0 : index
    %c0_24 = arith.constant 0 : index
    %17 = vector.load %arg9[%c0_22, %c0_23, %c0_24] : memref<1x64x128xf32, #tpu.memory_space<vmem>>, vector<1x64x128xf32>
    %18 = arith.addf %17, %16 : vector<1x64x128xf32>
    %c0_25 = arith.constant 0 : index
    %c0_26 = arith.constant 0 : index
    %c0_27 = arith.constant 0 : index
    %19 = vector.load %arg9[%c0_25, %c0_26, %c0_27] : memref<1x64x128xf32, #tpu.memory_space<vmem>>, vector<1x64x128xf32>
    tpu.vector_store %arg9[%c0_25, %c0_26, %c0_27], %18 {strides = array<i32>} : memref<1x64x128xf32, #tpu.memory_space<vmem>>, vector<1x64x128xf32>,
    %c0_i32_28 = arith.constant 0 : i32
    %20 = arith.cmpi eq, %arg2, %c0_i32_28 : i32
    %21 = arith.extui %20 : i1 to i32
    %c0_i32_29 = arith.constant 0 : i32
    %22 = arith.cmpi ne, %21, %c0_i32_29 : i32
    scf.if %22 {
      %c0_33 = arith.constant 0 : index
      %c0_34 = arith.constant 0 : index
      %c0_35 = arith.constant 0 : index
      %28 = vector.load %arg9[%c0_33, %c0_34, %c0_35] : memref<1x64x128xf32, #tpu.memory_space<vmem>>, vector<1x64x128xf32>
      %cst = arith.constant dense<0.000000e+00> : vector<1x64xf32>
      %29 = vector.multi_reduction <add>, %28, %cst [2] : vector<1x64x128xf32> to vector<1x64xf32>
      %c0_36 = arith.constant 0 : index
      %c0_37 = arith.constant 0 : index
      %c384 = arith.constant 384 : index
      %30 = vector.load %arg3[%c0_36, %c0_37, %c384] : memref<1x64x400xf32, #tpu.memory_space<vmem>>, vector<1x64x16xf32>
      %cst_38 = arith.constant dense<0.000000e+00> : vector<1x64xf32>
      %31 = vector.multi_reduction <add>, %30, %cst_38 [2] : vector<1x64x16xf32> to vector<1x64xf32>
      %32 = arith.addf %29, %31 : vector<1x64xf32>
      %cst_39 = arith.constant 2.500000e-03 : f32
      %33 = vector.broadcast %cst_39 : f32 to vector<1x64xf32>
      %34 = arith.mulf %32, %33 : vector<1x64xf32>
      %c64_i32 = arith.constant 64 : i32
      %35 = arith.muli %arg1, %c64_i32 : i32
      %36 = tpu.assume_multiple %35, 8 : i32
      %37 = arith.index_cast %36 : i32 to index
      %c0_40 = arith.constant 0 : index
      %38 = vector.load %arg4[%37, %c0_40] : memref<64x128xf32, #tpu.memory_space<vmem>>, vector<64x128xf32>
      %c0_41 = arith.constant 0 : index
      %c0_42 = arith.constant 0 : index
      %39 = vector.load %arg10[%c0_41, %c0_42] : memref<1x128xf32, #tpu.memory_space<vmem>>, vector<1x128xf32>
      %cst_43 = arith.constant dense<0.000000e+00> : vector<1x128xf32>
      %40 = tpu.matmul %34, %38, %cst_43 {dimension_numbers = #tpu.dot_dimension_numbers<[1], [0], [0], [1], [0, 0, 1, 1], [], []>} : vector<1x64xf32>, vector<64x128xf32>, vector<1x128xf32> -> vector<1x128xf32>
      %41 = arith.addf %39, %40 : vector<1x128xf32>
      %c0_44 = arith.constant 0 : index
      %c0_45 = arith.constant 0 : index
      %42 = vector.load %arg10[%c0_44, %c0_45] : memref<1x128xf32, #tpu.memory_space<vmem>>, vector<1x128xf32>
      tpu.vector_store %arg10[%c0_44, %c0_45], %41 {strides = array<i32>} : memref<1x128xf32, #tpu.memory_space<vmem>>, vector<1x128xf32>,
    } else {
    }
    %c0_i32_30 = arith.constant 0 : i32
    %23 = arith.cmpi eq, %arg1, %c0_i32_30 : i32
    %c0_i32_31 = arith.constant 0 : i32
    %24 = arith.cmpi eq, %arg2, %c0_i32_31 : i32
    %25 = arith.andi %23, %24 : i1
    %26 = arith.extui %25 : i1 to i32
    %c0_i32_32 = arith.constant 0 : i32
    %27 = arith.cmpi ne, %26, %c0_i32_32 : i32
    scf.if %27 {
      %c0_33 = arith.constant 0 : index
      %c0_34 = arith.constant 0 : index
      %28 = vector.load %arg10[%c0_33, %c0_34] : memref<1x128xf32, #tpu.memory_space<vmem>>, vector<1x128xf32>
      %c0_35 = arith.constant 0 : index
      %c0_36 = arith.constant 0 : index
      %29 = vector.load %arg5[%c0_35, %c0_36] : memref<1x128xf32, #tpu.memory_space<vmem>>, vector<1x128xf32>
      %30 = arith.addf %28, %29 : vector<1x128xf32>
      %cst = arith.constant 0.000000e+00 : f32
      %31 = vector.broadcast %cst : f32 to vector<1x128xf32>
      %32 = arith.maximumf %30, %31 : vector<1x128xf32>
      %c0_37 = arith.constant 0 : index
      %c0_38 = arith.constant 0 : index
      %33 = vector.load %arg6[%c0_37, %c0_38] : memref<128x64xf32, #tpu.memory_space<vmem>>, vector<128x64xf32>
      %cst_39 = arith.constant dense<0.000000e+00> : vector<1x64xf32>
      %34 = tpu.matmul %32, %33, %cst_39 {dimension_numbers = #tpu.dot_dimension_numbers<[1], [0], [0], [1], [0, 0, 1, 1], [], []>} : vector<1x128xf32>, vector<128x64xf32>, vector<1x64xf32> -> vector<1x64xf32>
      %c0_40 = arith.constant 0 : index
      %c0_41 = arith.constant 0 : index
      %35 = vector.load %arg7[%c0_40, %c0_41] : memref<1x64xf32, #tpu.memory_space<vmem>>, vector<1x64xf32>
      %36 = arith.addf %34, %35 : vector<1x64xf32>
      %37 = arith.negf %36 : vector<1x64xf32>
      %38 = math.exp %37 : vector<1x64xf32>
      %cst_42 = arith.constant 1.000000e+00 : f32
      %39 = vector.broadcast %cst_42 : f32 to vector<1x64xf32>
      %40 = arith.addf %39, %38 : vector<1x64xf32>
      %41 = arith.divf %39, %40 : vector<1x64xf32>
      %42 = vector.shape_cast %41 : vector<1x64xf32> to vector<1x1x64xf32>
      %c0_43 = arith.constant 0 : index
      %c0_44 = arith.constant 0 : index
      %c0_45 = arith.constant 0 : index
      %43 = vector.load %arg8[%c0_43, %c0_44, %c0_45] : memref<1x1x64xf32, #tpu.memory_space<vmem>>, vector<1x1x64xf32>
      tpu.vector_store %arg8[%c0_43, %c0_44, %c0_45], %42 {strides = array<i32>} : memref<1x1x64xf32, #tpu.memory_space<vmem>>, vector<1x1x64xf32>,
    } else {
    }
    return
  }
  func.func @transform_0(%arg0: i32, %arg1: i32, %arg2: i32) -> (i32, i32, i32) {
    %c0_i32 = arith.constant 0 : i32
    return %arg0, %arg1, %arg2 : i32, i32, i32
  }
  func.func @transform_1(%arg0: i32, %arg1: i32, %arg2: i32) -> (i32, i32) {
    %c0_i32 = arith.constant 0 : i32
    %c0_i32_0 = arith.constant 0 : i32
    %c0_i32_1 = arith.constant 0 : i32
    return %c0_i32, %c0_i32_0 : i32, i32
  }
  func.func @transform_2(%arg0: i32, %arg1: i32, %arg2: i32) -> (i32, i32) {
    %c0_i32 = arith.constant 0 : i32
    %c0_i32_0 = arith.constant 0 : i32
    %c0_i32_1 = arith.constant 0 : i32
    return %c0_i32, %c0_i32_0 : i32, i32
  }
  func.func @transform_3(%arg0: i32, %arg1: i32, %arg2: i32) -> (i32, i32) {
    %c0_i32 = arith.constant 0 : i32
    %c0_i32_0 = arith.constant 0 : i32
    %c0_i32_1 = arith.constant 0 : i32
    return %c0_i32, %c0_i32_0 : i32, i32
  }
  func.func @transform_4(%arg0: i32, %arg1: i32, %arg2: i32) -> (i32, i32) {
    %c0_i32 = arith.constant 0 : i32
    %c0_i32_0 = arith.constant 0 : i32
    %c0_i32_1 = arith.constant 0 : i32
    return %c0_i32, %c0_i32_0 : i32, i32
  }
  func.func @transform_5(%arg0: i32, %arg1: i32, %arg2: i32) -> (i32, i32, i32) {
    %c0_i32 = arith.constant 0 : i32
    %c0_i32_0 = arith.constant 0 : i32
    %c0_i32_1 = arith.constant 0 : i32
    return %arg0, %c0_i32, %c0_i32_0 : i32, i32, i32
  }
}

module attributes {stable_mosaic.version = 11 : i64} {
  func.func @_channel_attn_kernel(%arg0: i32, %arg1: i32, %arg2: i32, %arg3: memref<1x64x400xf32, #tpu.memory_space<vmem>>, %arg4: memref<64x128xf32, #tpu.memory_space<vmem>>, %arg5: memref<1x128xf32, #tpu.memory_space<vmem>>, %arg6: memref<128x64xf32, #tpu.memory_space<vmem>>, %arg7: memref<1x64xf32, #tpu.memory_space<vmem>>, %arg8: memref<1x1x64xf32, #tpu.memory_space<vmem>>, %arg9: memref<1x64x128xf32, #tpu.memory_space<vmem>>, %arg10: memref<1x128xf32, #tpu.memory_space<vmem>>) attributes {dimension_semantics = [#tpu.dimension_semantics<parallel>, #tpu.dimension_semantics<arbitrary>, #tpu.dimension_semantics<arbitrary>], iteration_bounds = array<i64: 2, 1, 1>, scalar_prefetch = 0 : i64, scratch_operands = 2 : i64, tpu.core_type = #tpu.core_type<tc>, window_params = [{transform_indices = @transform_0, window_bounds = array<i64: 1, 64, 400>}, {pipeline_mode = #tpu.pipeline_mode<synchronous>, transform_indices = @transform_1, window_bounds = array<i64: 64, 128>}, {pipeline_mode = #tpu.pipeline_mode<synchronous>, transform_indices = @transform_2, window_bounds = array<i64: 1, 128>}, {pipeline_mode = #tpu.pipeline_mode<synchronous>, transform_indices = @transform_3, window_bounds = array<i64: 128, 64>}, {pipeline_mode = #tpu.pipeline_mode<synchronous>, transform_indices = @transform_4, window_bounds = array<i64: 1, 64>}, {transform_indices = @transform_5, window_bounds = array<i64: 1, 1, 64>}]} {
    %c0_i32 = arith.constant 0 : i32
    %0 = arith.cmpi eq, %arg2, %c0_i32 : i32
    %1 = arith.extui %0 : i1 to i32
    %c0_i32_0 = arith.constant 0 : i32
    %2 = arith.cmpi ne, %1, %c0_i32_0 : i32
    scf.if %2 {
      %cst = arith.constant 0.000000e+00 : f32
      %28 = vector.broadcast %cst : f32 to vector<1x64x128xf32>
      %c0_33 = arith.constant 0 : index
      %c0_34 = arith.constant 0 : index
      %c0_35 = arith.constant 0 : index
      %29 = vector.load %arg9[%c0_33, %c0_34, %c0_35] : memref<1x64x128xf32, #tpu.memory_space<vmem>>, vector<1x64x128xf32>
      tpu.vector_store %arg9[%c0_33, %c0_34, %c0_35], %28 {strides = array<i32>} : memref<1x64x128xf32, #tpu.memory_space<vmem>>, vector<1x64x128xf32>,
    } else {
    }
    %c0_i32_1 = arith.constant 0 : i32
    %3 = arith.cmpi eq, %arg1, %c0_i32_1 : i32
    %c0_i32_2 = arith.constant 0 : i32
    %4 = arith.cmpi eq, %arg2, %c0_i32_2 : i32
    %5 = arith.andi %3, %4 : i1
    %6 = arith.extui %5 : i1 to i32
    %c0_i32_3 = arith.constant 0 : i32
    %7 = arith.cmpi ne, %6, %c0_i32_3 : i32
    scf.if %7 {
      %cst = arith.constant 0.000000e+00 : f32
      %28 = vector.broadcast %cst : f32 to vector<1x128xf32>
      %c0_33 = arith.constant 0 : index
      %c0_34 = arith.constant 0 : index
      %29 = vector.load %arg10[%c0_33, %c0_34] : memref<1x128xf32, #tpu.memory_space<vmem>>, vector<1x128xf32>
      tpu.vector_store %arg10[%c0_33, %c0_34], %28 {strides = array<i32>} : memref<1x128xf32, #tpu.memory_space<vmem>>, vector<1x128xf32>,
    } else {
    }
    %c0 = arith.constant 0 : index
    %c0_4 = arith.constant 0 : index
    %c0_5 = arith.constant 0 : index
    %8 = vector.load %arg3[%c0, %c0_4, %c0_5] : memref<1x64x400xf32, #tpu.memory_space<vmem>>, vector<1x64x128xf32>
    %c0_6 = arith.constant 0 : index
    %c0_7 = arith.constant 0 : index
    %c0_8 = arith.constant 0 : index
    %9 = vector.load %arg9[%c0_6, %c0_7, %c0_8] : memref<1x64x128xf32, #tpu.memory_space<vmem>>, vector<1x64x128xf32>
    %10 = arith.addf %9, %8 : vector<1x64x128xf32>
    %c0_9 = arith.constant 0 : index
    %c0_10 = arith.constant 0 : index
    %c0_11 = arith.constant 0 : index
    %11 = vector.load %arg9[%c0_9, %c0_10, %c0_11] : memref<1x64x128xf32, #tpu.memory_space<vmem>>, vector<1x64x128xf32>
    tpu.vector_store %arg9[%c0_9, %c0_10, %c0_11], %10 {strides = array<i32>} : memref<1x64x128xf32, #tpu.memory_space<vmem>>, vector<1x64x128xf32>,
    %c0_12 = arith.constant 0 : index
    %c0_13 = arith.constant 0 : index
    %c128 = arith.constant 128 : index
    %12 = vector.load %arg3[%c0_12, %c0_13, %c128] : memref<1x64x400xf32, #tpu.memory_space<vmem>>, vector<1x64x128xf32>
    %c0_14 = arith.constant 0 : index
    %c0_15 = arith.constant 0 : index
    %c0_16 = arith.constant 0 : index
    %13 = vector.load %arg9[%c0_14, %c0_15, %c0_16] : memref<1x64x128xf32, #tpu.memory_space<vmem>>, vector<1x64x128xf32>
    %14 = arith.addf %13, %12 : vector<1x64x128xf32>
    %c0_17 = arith.constant 0 : index
    %c0_18 = arith.constant 0 : index
    %c0_19 = arith.constant 0 : index
    %15 = vector.load %arg9[%c0_17, %c0_18, %c0_19] : memref<1x64x128xf32, #tpu.memory_space<vmem>>, vector<1x64x128xf32>
    tpu.vector_store %arg9[%c0_17, %c0_18, %c0_19], %14 {strides = array<i32>} : memref<1x64x128xf32, #tpu.memory_space<vmem>>, vector<1x64x128xf32>,
    %c0_20 = arith.constant 0 : index
    %c0_21 = arith.constant 0 : index
    %c256 = arith.constant 256 : index
    %16 = vector.load %arg3[%c0_20, %c0_21, %c256] : memref<1x64x400xf32, #tpu.memory_space<vmem>>, vector<1x64x128xf32>
    %c0_22 = arith.constant 0 : index
    %c0_23 = arith.constant 0 : index
    %c0_24 = arith.constant 0 : index
    %17 = vector.load %arg9[%c0_22, %c0_23, %c0_24] : memref<1x64x128xf32, #tpu.memory_space<vmem>>, vector<1x64x128xf32>
    %18 = arith.addf %17, %16 : vector<1x64x128xf32>
    %c0_25 = arith.constant 0 : index
    %c0_26 = arith.constant 0 : index
    %c0_27 = arith.constant 0 : index
    %19 = vector.load %arg9[%c0_25, %c0_26, %c0_27] : memref<1x64x128xf32, #tpu.memory_space<vmem>>, vector<1x64x128xf32>
    tpu.vector_store %arg9[%c0_25, %c0_26, %c0_27], %18 {strides = array<i32>} : memref<1x64x128xf32, #tpu.memory_space<vmem>>, vector<1x64x128xf32>,
    %c0_i32_28 = arith.constant 0 : i32
    %20 = arith.cmpi eq, %arg2, %c0_i32_28 : i32
    %21 = arith.extui %20 : i1 to i32
    %c0_i32_29 = arith.constant 0 : i32
    %22 = arith.cmpi ne, %21, %c0_i32_29 : i32
    scf.if %22 {
      %c0_33 = arith.constant 0 : index
      %c0_34 = arith.constant 0 : index
      %c0_35 = arith.constant 0 : index
      %28 = vector.load %arg9[%c0_33, %c0_34, %c0_35] : memref<1x64x128xf32, #tpu.memory_space<vmem>>, vector<1x64x128xf32>
      %cst = arith.constant dense<0.000000e+00> : vector<1x64xf32>
      %29 = vector.multi_reduction <add>, %28, %cst [2] : vector<1x64x128xf32> to vector<1x64xf32>
      %c0_36 = arith.constant 0 : index
      %c0_37 = arith.constant 0 : index
      %c384 = arith.constant 384 : index
      %30 = vector.load %arg3[%c0_36, %c0_37, %c384] : memref<1x64x400xf32, #tpu.memory_space<vmem>>, vector<1x64x16xf32>
      %cst_38 = arith.constant dense<0.000000e+00> : vector<1x64xf32>
      %31 = vector.multi_reduction <add>, %30, %cst_38 [2] : vector<1x64x16xf32> to vector<1x64xf32>
      %32 = arith.addf %29, %31 : vector<1x64xf32>
      %cst_39 = arith.constant 2.500000e-03 : f32
      %33 = vector.broadcast %cst_39 : f32 to vector<1x64xf32>
      %34 = arith.mulf %32, %33 : vector<1x64xf32>
      %c64_i32 = arith.constant 64 : i32
      %35 = arith.muli %arg1, %c64_i32 : i32
      %36 = tpu.assume_multiple %35, 8 : i32
      %37 = arith.index_cast %36 : i32 to index
      %c0_40 = arith.constant 0 : index
      %38 = vector.load %arg4[%37, %c0_40] : memref<64x128xf32, #tpu.memory_space<vmem>>, vector<64x128xf32>
      %c0_41 = arith.constant 0 : index
      %c0_42 = arith.constant 0 : index
      %39 = vector.load %arg10[%c0_41, %c0_42] : memref<1x128xf32, #tpu.memory_space<vmem>>, vector<1x128xf32>
      %cst_43 = arith.constant dense<0.000000e+00> : vector<1x128xf32>
      %40 = tpu.matmul %34, %38, %cst_43 {dimension_numbers = #tpu.dot_dimension_numbers<[1], [0], [0], [1], [0, 0, 1, 1], [], []>} : vector<1x64xf32>, vector<64x128xf32>, vector<1x128xf32> -> vector<1x128xf32>
      %41 = arith.addf %39, %40 : vector<1x128xf32>
      %c0_44 = arith.constant 0 : index
      %c0_45 = arith.constant 0 : index
      %42 = vector.load %arg10[%c0_44, %c0_45] : memref<1x128xf32, #tpu.memory_space<vmem>>, vector<1x128xf32>
      tpu.vector_store %arg10[%c0_44, %c0_45], %41 {strides = array<i32>} : memref<1x128xf32, #tpu.memory_space<vmem>>, vector<1x128xf32>,
    } else {
    }
    %c0_i32_30 = arith.constant 0 : i32
    %23 = arith.cmpi eq, %arg1, %c0_i32_30 : i32
    %c0_i32_31 = arith.constant 0 : i32
    %24 = arith.cmpi eq, %arg2, %c0_i32_31 : i32
    %25 = arith.andi %23, %24 : i1
    %26 = arith.extui %25 : i1 to i32
    %c0_i32_32 = arith.constant 0 : i32
    %27 = arith.cmpi ne, %26, %c0_i32_32 : i32
    scf.if %27 {
      %c0_33 = arith.constant 0 : index
      %c0_34 = arith.constant 0 : index
      %28 = vector.load %arg10[%c0_33, %c0_34] : memref<1x128xf32, #tpu.memory_space<vmem>>, vector<1x128xf32>
      %c0_35 = arith.constant 0 : index
      %c0_36 = arith.constant 0 : index
      %29 = vector.load %arg5[%c0_35, %c0_36] : memref<1x128xf32, #tpu.memory_space<vmem>>, vector<1x128xf32>
      %30 = arith.addf %28, %29 : vector<1x128xf32>
      %cst = arith.constant 0.000000e+00 : f32
      %31 = vector.broadcast %cst : f32 to vector<1x128xf32>
      %32 = arith.maximumf %30, %31 : vector<1x128xf32>
      %c0_37 = arith.constant 0 : index
      %c0_38 = arith.constant 0 : index
      %33 = vector.load %arg6[%c0_37, %c0_38] : memref<128x64xf32, #tpu.memory_space<vmem>>, vector<128x64xf32>
      %cst_39 = arith.constant dense<0.000000e+00> : vector<1x64xf32>
      %34 = tpu.matmul %32, %33, %cst_39 {dimension_numbers = #tpu.dot_dimension_numbers<[1], [0], [0], [1], [0, 0, 1, 1], [], []>} : vector<1x128xf32>, vector<128x64xf32>, vector<1x64xf32> -> vector<1x64xf32>
      %c0_40 = arith.constant 0 : index
      %c0_41 = arith.constant 0 : index
      %35 = vector.load %arg7[%c0_40, %c0_41] : memref<1x64xf32, #tpu.memory_space<vmem>>, vector<1x64xf32>
      %36 = arith.addf %34, %35 : vector<1x64xf32>
      %37 = arith.negf %36 : vector<1x64xf32>
      %38 = math.exp %37 : vector<1x64xf32>
      %cst_42 = arith.constant 1.000000e+00 : f32
      %39 = vector.broadcast %cst_42 : f32 to vector<1x64xf32>
      %40 = arith.addf %39, %38 : vector<1x64xf32>
      %41 = arith.divf %39, %40 : vector<1x64xf32>
      %42 = vector.shape_cast %41 : vector<1x64xf32> to vector<1x1x64xf32>
      %c0_43 = arith.constant 0 : index
      %c0_44 = arith.constant 0 : index
      %c0_45 = arith.constant 0 : index
      %43 = vector.load %arg8[%c0_43, %c0_44, %c0_45] : memref<1x1x64xf32, #tpu.memory_space<vmem>>, vector<1x1x64xf32>
      tpu.vector_store %arg8[%c0_43, %c0_44, %c0_45], %42 {strides = array<i32>} : memref<1x1x64xf32, #tpu.memory_space<vmem>>, vector<1x1x64xf32>,
    } else {
    }
    return
  }
  func.func @transform_0(%arg0: i32, %arg1: i32, %arg2: i32) -> (i32, i32, i32) {
    %c0_i32 = arith.constant 0 : i32
    return %arg0, %arg1, %arg2 : i32, i32, i32
  }
  func.func @transform_1(%arg0: i32, %arg1: i32, %arg2: i32) -> (i32, i32) {
    %c0_i32 = arith.constant 0 : i32
    %c0_i32_0 = arith.constant 0 : i32
    %c0_i32_1 = arith.constant 0 : i32
    return %c0_i32, %c0_i32_0 : i32, i32
  }
  func.func @transform_2(%arg0: i32, %arg1: i32, %arg2: i32) -> (i32, i32) {
    %c0_i32 = arith.constant 0 : i32
    %c0_i32_0 = arith.constant 0 : i32
    %c0_i32_1 = arith.constant 0 : i32
    return %c0_i32, %c0_i32_0 : i32, i32
  }
  func.func @transform_3(%arg0: i32, %arg1: i32, %arg2: i32) -> (i32, i32) {
    %c0_i32 = arith.constant 0 : i32
    %c0_i32_0 = arith.constant 0 : i32
    %c0_i32_1 = arith.constant 0 : i32
    return %c0_i32, %c0_i32_0 : i32, i32
  }
  func.func @transform_4(%arg0: i32, %arg1: i32, %arg2: i32) -> (i32, i32) {
    %c0_i32 = arith.constant 0 : i32
    %c0_i32_0 = arith.constant 0 : i32
    %c0_i32_1 = arith.constant 0 : i32
    return %c0_i32, %c0_i32_0 : i32, i32
  }
  func.func @transform_5(%arg0: i32, %arg1: i32, %arg2: i32) -> (i32, i32, i32) {
    %c0_i32 = arith.constant 0 : i32
    %c0_i32_0 = arith.constant 0 : i32
    %c0_i32_1 = arith.constant 0 : i32
    return %arg0, %c0_i32, %c0_i32_0 : i32, i32, i32
  }
}

</mosaic_0001>

<bundles_post_ra>
// kernel: tpu_custom_call.1
= control target key start
LH: loop header
LB: loop body
LE: loop exit
PB: predicated region body
PF: predicated region fallthrough
CT: control target
= control target key end

     0   :  { %10 = vsyncpa [#allocation5], 0  ;;  %s1406_s0 = inlined_call_operand.hbm [shape: f32[2,64,400], index: 0, kind: input, shape index: {}]   ;;  %s1407_s1 = inlined_call_operand.vmem [shape: f32[64,128], index: 1, kind: input, shape index: {}]   ;;  %s1408_s2 = inlined_call_operand.vmem [shape: f32[1,128], index: 2, kind: input, shape index: {}]   ;;  %s1409_s3 = inlined_call_operand.vmem [shape: f32[128,64], index: 3, kind: input, shape index: {}]   ;;  %s1410_s4 = inlined_call_operand.vmem [shape: f32[1,64], index: 4, kind: input, shape index: {}]   ;;  %s1411_s5 = inlined_call_operand.hbm [shape: f32[2,1,64], index: 5, kind: output, shape index: {}]  }
   0x1   :  { %12 = vsyncpa [#allocation5 + $0x1], 0 }
   0x2   :  { %13 = vsyncpa [#allocation6], 0 }
   0x3   :  { %15 = vsyncpa [#allocation6 + $0x1], 0  ;;  %s1120_s18 = smov 0   ;;  %s1122_s19 = smov 0  }
   0x4   :  { %s1124_s20 = smov 0   ;;  %s1126_s21 = smov 0  }
   0x5   :  { %s1128_s22 = smov 0   ;;  %s1130_s23 = smov 0  }
   0x6 LB: > { %s809_s24 = sadd.s32 4294967295, %s1082_s23   ;;  %s810_s25 = sadd.s32 4294967294, %s1082_s23   ;;  %s1082_s23 = sphi %s1130_s23, %s21_s23   ;;  %s1078_s22 = sphi %s1128_s22, %s1422_s22   ;;  %s1074_s21 = sphi %s1126_s21, %s1421_s21   ;;  %s1070_s20 = sphi %s1124_s20, %s1420_s20   ;;  %s1066_s19 = sphi %s1122_s19, %s1419_s19   ;;  %s1062_s18 = sphi %s1120_s18, %s1418_s18  }
   0x7   : > { %s40_s26 = sadd.s32 1, %s1078_s22  ;;  %s51_s27 = sadd.s32 1, %s1070_s20 }
   0x8   : > { %p42_p0 = scmp.ge.s32.totalorder %s40_s26, 2  ;;  %p58_p1 = scmp.ne.s32.totalorder %s1070_s20, %s1066_s19 }
   0x9   : > { %p59_p2 = scmp.eq.s32.totalorder %s1082_s23, 0  ;;  %p64_p3 = scmp.ne.s32.totalorder %s1066_s19, %s1062_s18 }
   0xa   : > { %s1424_s26 = smov (%p42_p0, %s40_s26), 0  ;;  %p65_p5 = scmp.eq.s32.totalorder %s809_s24, 0 }
   0xb   : > { %p1161_p4 = por %p59_p2, %p58_p1  ;;  %s44_s29 = ssub.s32 %s1078_s22, %s1424_s26 }
   0xc   : > { %p172_p6 = scmp.eq.s32.totalorder %s809_s24, 1  ;;  %p49_p7 = scmp.eq.s32.totalorder %s44_s29, 0 }
   0xd   : > { %p1167_p8 = por %p65_p5, %p64_p3  ;;  %p178_p10 = scmp.eq.s32.totalorder %s810_s25, 1 }
   0xe   : > { %p1171_p9 = por %p172_p6, %p58_p1  ;;  %p916_p13 = scmp.lt.s32.totalorder %s1082_s23, 2 }
   0xf   : > { %s1176_s7 = scalar_select %p49_p7, %s1070_s20, %s51_s27  }
  0x10   : > { %p1178_p11 = por %p178_p10, %p64_p3  ;;  %s210_s9 = sand.u32 1, %s1070_s20  }
  0x11   : > { %s813_s10 = sshll.u32 %s210_s9, 8  ;;  %s823_s11 = sshll.u32 %s1078_s22, 12 }
  0x12   : > { %s225_s14 = scalar_lea.hbm %s1406_s0, %s823_s11  ;;  %s214_s15 = scalar_lea.vmem [#allocation4], %s813_s10 }
  0x13   : > { %s226_s16 = sshll.u32 %s214_s15, 4  ;;  %p1191_p0 = pnand %p916_p13, %p1161_p4  ;;  %s227_s16 = int_to_ptr.vmem [resolvable:$true] %s226_s16 }
  0x14   : > { %p816_p1 = scmp.ge.s32.totalorder %s1082_s23, 1  ;;  %s211_s24 = scalar_lea.sflag [#allocation5], %s210_s9 }
  0x15   : > { %p976_p2 = pneg %p1191_p0  ;;  %s987_s25 = scalar_lea.vmem %s227_s16, 4096 }
  0x16   : > { %p988_p3 = scmp.ne.s32.totalorder %s227_s16, %s987_s25  ;;  %s1084_s27 = smov [#allocation4]  }
  0x17   : > { %s992_s29 = sshll.u32 %s1084_s27, 4  ;;  %s993_s29 = int_to_ptr.vmem [resolvable:$false] %s992_s29 }
  0x18   : > { %p990_p5 = pnand %p988_p3, %p976_p2  ;;  %s994_s10 = scalar_lea.vmem %s993_s29, 8192 }
  0x19   : > { %p995_p7 = scmp.lt.s32.totalorder %s227_s16, %s993_s29  ;;  %p996_p10 = scmp.lt.s32.totalorder %s994_s10, %s987_s25 }
  0x1a   : > { %p991_p6 = pneg %p990_p5 }
  0x1b   : > { %p997_p12 = por %p996_p10, %p995_p7 }
  0x1d   : > { %p998_p4 = pnand %p997_p12, %p991_p6 }
  0x1f   : > { %1001 = shalt.err (!%p998_p4)
}
  0x20   : > { %s1085_s28 = smov 512   ;;  %s1086_s9 = smov 32  }
  0x21   : > { %911 = dma.hbm_to_vmem [thread:$0]  (!%p1191_p0), %s225_s14, 4096, %s227_s16, %s211_s24, %s1085_s28, %s1085_s28, %s1086_s9  }
  0x22   : > { %p234_p13 = scmp.lt.s32.totalorder %s1082_s23, 3 }
  0x24   : > { %p235_p2 = pnand %p816_p1, %p234_p13 }
  0x25   : > { %s1204_s11 = sand.u32 (!%p235_p2), 1, %s1066_s19  }
  0x26   : > { %238 = sbr.rel (%p235_p2) target bundleno = 670 (0x29e), region = 40  ;;  %s817_s12 = sshll.u32 (!%p235_p2), %s1204_s11, 8 }
  0x27   : > { %s241_s13 = scalar_lea.sflag (!%p235_p2), [#allocation5], %s1204_s11  ;;  %s1208_s15 = scalar_lea.vmem (!%p235_p2), [#allocation4], %s817_s12 }
  0x2b   : > { %1053 = dma.done.wait (%p1167_p8), %s241_s13, 4096  }
  0x2c   : > { %1055 = vsyncadd (%p1167_p8), %s241_s13, 4294963200  ;;  %vm421_vm0 = vcmask 130048   ;;  %v413_v0 = vld [vmem:[%s1208_s15 + $0x18] sm:$0xff]  ;;  %v290_v1 = vld [vmem:[%s1208_s15] sm:$0xff]  ;;  %v1087_v56 = vmov 0.0   ;;  %vm1088_vm1 = vmmov 0  }
  0x2d   : > { %v322_v2 = vld [vmem:[%s1208_s15 + $0x8] sm:$0xff]  ;;  %v422_v3 = vsel %vm421_vm0, %v413_v0, 0.0  ;;  %v354_v5 = vld [vmem:[%s1208_s15 + $0x10] sm:$0xff]  ;;  %v414_v6 = vld [vmem:[%s1208_s15 + $0x38] sm:$0xff]  ;;  %850 = vmatprep.subr.mxu0 %v1087_v56  ;;  %289 = vst [vmem:[#allocation3] sm:$0x1] %v1087_v56  ;;  %869 = vmatprep.subr.mxu1 %v1087_v56 }
  0x2e   : > { %v338_v4 = vadd.f32 %v322_v2, %v290_v1  ;;  %v291_v7 = vld [vmem:[%s1208_s15 + $0x20] sm:$0xff]  ;;  %423 = vadd.xlane.f32.xlu1 %v422_v3  ;;  %v323_v8 = vld [vmem:[%s1208_s15 + $0x28] sm:$0xff]  ;;  %v355_v9 = vld [vmem:[%s1208_s15 + $0x30] sm:$0xff]  ;;  %v425_v11 = vsel %vm421_vm0, %v414_v6, 0.0  ;;  %866 = vmatprep.mubr.msk.f32.mxu0 %vm1088_vm1, %v1087_v56  ;;  %vm492_vm2 = vcmask 130112   ;;  %vm499_vm3 = vcmask 195712  }
  0x2f   : > { %v339_v12 = vadd.f32 %v323_v8, %v291_v7  ;;  %v292_v13 = vld [vmem:[%s1208_s15 + $0x40] sm:$0xff]  ;;  %v324_v14 = vld [vmem:[%s1208_s15 + $0x48] sm:$0xff]  ;;  %v415_v15 = vld [vmem:[%s1208_s15 + $0x58] sm:$0xff]  ;;  %901 = vmatprep.mubr.msk.f32.mxu1 %vm1088_vm1, %v1087_v56  ;;  %vm506_vm4 = vcmask 261312   ;;  %vm513_vm5 = vcmask 326912   ;;  %vm520_vm6 = vcmask 392512  }
  0x30   : > { %v370_v10 = vadd.f32 %v354_v5, %v338_v4  ;;  %v340_v17 = vadd.f32 %v324_v14, %v292_v13  ;;  %v356_v18 = vld [vmem:[%s1208_s15 + $0x50] sm:$0xff]  ;;  %v293_v19 = vld [vmem:[%s1208_s15 + $0x60] sm:$0xff]  ;;  %v325_v20 = vld [vmem:[%s1208_s15 + $0x68] sm:$0xff]  ;;  %v428_v21 = vsel %vm421_vm0, %v415_v15, 0.0  ;;  %vm527_vm7 = vcmask 458112   ;;  %s820_s9 = sshll.u32 %s1074_s21, 4 }
  0x31   : > { %v371_v16 = vadd.f32 %v355_v9, %v339_v12  ;;  %v416_v22 = vld [vmem:[%s1208_s15 + $0x78] sm:$0xff]  ;;  %v341_v24 = vadd.f32 %v325_v20, %v293_v19  ;;  %v357_v25 = vld [vmem:[%s1208_s15 + $0x70] sm:$0xff]  ;;  %v294_v26 = vld [vmem:[%s1208_s15 + $0x80] sm:$0xff]  ;;  %vm534_vm8 = vcmask 523712   ;;  %vm536_vm9 = vcmask 523264   ;;  %s269_s12 = scalar_lea.vmem [#allocation7], %s1204_s11  ;;  %s1364_s14 = scalar_lea.hbm %s1411_s5, %s820_s9 }
  0x32   : > { %397 = vadd.xlane.f32.xlu0 %v370_v10  ;;  %426 = vadd.xlane.f32.xlu1 %v425_v11  ;;  %v372_v23 = vadd.f32 %v356_v18, %v340_v17  ;;  %v326_v27 = vld [vmem:[%s1208_s15 + $0x88] sm:$0xff]  ;;  %v431_v28 = vsel %vm421_vm0, %v416_v22, 0.0  ;;  %v417_v29 = vld [vmem:[%s1208_s15 + $0x98] sm:$0xff]  ;;  %v358_v32 = vld [vmem:[%s1208_s15 + $0x90] sm:$0xff]  ;;  %s725_s13 = sshll.u32 %s269_s12, 4  ;;  %vm710_vm10 = vcmask 516096   ;;  %s726_s13 = int_to_ptr.vmem [resolvable:$true] %s725_s13 }
  0x33   : > { %v373_v30 = vadd.f32 %v357_v25, %v341_v24  ;;  %v342_v31 = vadd.f32 %v326_v27, %v294_v26  ;;  %v295_v33 = vld [vmem:[%s1208_s15 + $0xa0] sm:$0xff]  ;;  %v327_v34 = vld [vmem:[%s1208_s15 + $0xa8] sm:$0xff]  ;;  %v434_v35 = vsel %vm421_vm0, %v417_v29, 0.0  ;;  %v418_v36 = vld [vmem:[%s1208_s15 + $0xb8] sm:$0xff]  ;;  %s713_s16 = scalar_lea.sflag [#allocation6], %s1204_s11  ;;  %s1002_s17 = scalar_lea.vmem %s726_s13, 16 }
  0x34   : > { %v343_v38 = vadd.f32 %v327_v34, %v295_v33  ;;  %v359_v39 = vld [vmem:[%s1208_s15 + $0xb0] sm:$0xff]  ;;  %v296_v40 = vld [vmem:[%s1208_s15 + $0xc0] sm:$0xff]  ;;  %v328_v41 = vld [vmem:[%s1208_s15 + $0xc8] sm:$0xff]  ;;  %v437_v42 = vsel %vm421_vm0, %v418_v36, 0.0  ;;  %p1003_p8 = scmp.ne.s32.totalorder %s726_s13, %s1002_s17  ;;  %s1089_s24 = smov [#allocation7]  }
  0x35   : > { %v374_v37 = vadd.f32 %v358_v32, %v342_v31  ;;  %v419_v43 = vld [vmem:[%s1208_s15 + $0xd8] sm:$0xff]  ;;  %v344_v45 = vadd.f32 %v328_v41, %v296_v40  ;;  %v360_v46 = vld [vmem:[%s1208_s15 + $0xd0] sm:$0xff]  ;;  %v297_v47 = vld [vmem:[%s1208_s15 + $0xe0] sm:$0xff]  ;;  %s1006_s25 = sshll.u32 %s1089_s24, 4  ;;  %s1007_s25 = int_to_ptr.vmem [resolvable:$false] %s1006_s25 }
  0x36   : > { %399 = vadd.xlane.f32.xlu0 %v371_v16  ;;  %429 = vadd.xlane.f32.xlu1 %v428_v21  ;;  %v375_v44 = vadd.f32 %v359_v39, %v343_v38  ;;  %v329_v48 = vld [vmem:[%s1208_s15 + $0xe8] sm:$0xff]  ;;  %v440_v49 = vsel %vm421_vm0, %v419_v43, 0.0  ;;  %v420_v50 = vld [vmem:[%s1208_s15 + $0xf8] sm:$0xff]  ;;  %v361_v53 = vld [vmem:[%s1208_s15 + $0xf0] sm:$0xff]  ;;  %v481_v16 = vlaneseq  ;;  %p1004_p12 = pnand %p1003_p8, %p1171_p9  ;;  %s1008_s21 = scalar_lea.vmem %s1007_s25, 32 }
  0x37   : > { %v376_v51 = vadd.f32 %v360_v46, %v344_v45  ;;  %v345_v52 = vadd.f32 %v329_v48, %v297_v47  ;;  %v443_v54 = vsel %vm421_vm0, %v420_v50, 0.0  ;;  %v471_v57 = vld [vmem:[%s1407_s1 + $0x38] sm:$0xff]  ;;  %v470_v58 = vld [vmem:[%s1407_s1 + $0x30] sm:$0xff]  ;;  %v469_v59 = vld [vmem:[%s1407_s1 + $0x28] sm:$0xff]  ;;  %p1009_p1 = scmp.lt.s32.totalorder %s726_s13, %s1007_s25  ;;  %p1010_p3 = scmp.lt.s32.totalorder %s1008_s21, %s1002_s17 }
  0x38   : > { %851 = vmatpush3.msra.mxu0 %v471_v57  ;;  %v468_v60 = vld [vmem:[%s1407_s1 + $0x20] sm:$0xff]  ;;  %v467_v61 = vld [vmem:[%s1407_s1 + $0x18] sm:$0xff]  ;;  %v466_v62 = vld [vmem:[%s1407_s1 + $0x10] sm:$0xff]  ;;  %v482_v19 = vand.u32 127, %v481_v16  ;;  %v484_v26 = vshrl.u32 %v481_v16, 7  ;;  %p1005_p0 = pneg %p1004_p12 }
  0x39   : > { %v377_v55 = vadd.f32 %v361_v53, %v345_v52  ;;  %852 = vmatprep.subr.mxu0 %v1087_v56  ;;  %v465_v63 = vld [vmem:[%s1407_s1 + $0x8] sm:$0xff]  ;;  %v464_v0 = vld [vmem:[%s1407_s1] sm:$0xff]  ;;  %v632_v1 = vld [vmem:[%s1409_s3 + $0x78] sm:$0xff]  ;;  %p1011_p5 = por %p1010_p3, %p1009_p1 }
  0x3a   : > { %401 = vadd.xlane.f32.xlu0 %v372_v23  ;;  %432 = vadd.xlane.f32.xlu1 %v431_v28  ;;  %v631_v2 = vld [vmem:[%s1409_s3 + $0x70] sm:$0xff]  ;;  %v630_v3 = vld [vmem:[%s1409_s3 + $0x68] sm:$0xff]  ;;  %v629_v4 = vld [vmem:[%s1409_s3 + $0x60] sm:$0xff]  ;;  %v487_v21 = vadd.s32 4294967288, %v482_v19  ;;  %v494_v24 = vadd.s32 4294967280, %v482_v19  ;;  %v501_v28 = vadd.s32 4294967272, %v482_v19  ;;  %v485_v41 = vsub.s32 %v482_v19, %v484_v26 }
  0x3b   : > { %853 = vmatpush3.msra.mxu0 %v470_v58  ;;  %870 = vmatpush3.msra.mxu1 %v632_v1  ;;  %v628_v5 = vld [vmem:[%s1409_s3 + $0x58] sm:$0xff]  ;;  %v627_v6 = vld [vmem:[%s1409_s3 + $0x50] sm:$0xff]  ;;  %v626_v7 = vld [vmem:[%s1409_s3 + $0x48] sm:$0xff]  ;;  %v515_v32 = vadd.s32 4294967256, %v482_v19  ;;  %v522_v40 = vadd.s32 4294967248, %v482_v19  ;;  %v529_v52 = vadd.s32 4294967240, %v482_v19  ;;  %p1012_p6 = pnand %p1011_p5, %p1005_p0 }
  0x3c   : > { %854 = vmatprep.subr.mxu0 %v1087_v56  ;;  %871 = vmatprep.subr.mxu1 %v1087_v56  ;;  %v625_v8 = vld [vmem:[%s1409_s3 + $0x40] sm:$0xff]  ;;  %v490_v34 = vsub.s32 %v487_v21, %v484_v26  ;;  %v497_v38 = vsub.s32 %v494_v24, %v484_v26  ;;  %v504_v43 = vsub.s32 %v501_v28, %v484_v26  ;;  %v619_v16 = vld [vmem:[%s1409_s3 + $0x10] sm:$0xff] }
  0x3d   : > { %855 = vmatpush3.msra.mxu0 %v469_v59  ;;  %872 = vmatpush3.msra.mxu1 %v631_v2  ;;  %v518_v47 = vsub.s32 %v515_v32, %v484_v26 }
  0x3e   : > { %403 = vadd.xlane.f32.xlu0 %v373_v30  ;;  %435 = vadd.xlane.f32.xlu1 %v434_v35  ;;  %v508_v30 = vadd.s32 4294967264, %v482_v19  ;;  %v472_v19 = vld [vmem:[#allocation3] sm:$0x1] }
  0x3f   : > { %856 = vmatprep.subr.mxu0 %v1087_v56  ;;  %873 = vmatprep.subr.mxu1 %v1087_v56 }
  0x40   : > { %857 = vmatpush3.msra.mxu0 %v468_v60  ;;  %874 = vmatpush3.msra.mxu1 %v630_v3  ;;  %v511_v45 = vsub.s32 %v508_v30, %v484_v26 }
  0x41   : > { %858 = vmatprep.subr.mxu0 %v1087_v56  ;;  %875 = vmatprep.subr.mxu1 %v1087_v56 }
  0x42   : > { %405 = vadd.xlane.f32.xlu0 %v374_v37  ;;  %438 = vadd.xlane.f32.xlu1 %v437_v42 }
  0x43   : > { %859 = vmatpush3.msra.mxu0 %v467_v61  ;;  %876 = vmatpush3.msra.mxu1 %v629_v4 }
  0x44   : > { %860 = vmatprep.subr.mxu0 %v1087_v56  ;;  %877 = vmatprep.subr.mxu1 %v1087_v56 }
  0x45   : > { %861 = vmatpush3.msra.mxu0 %v466_v62  ;;  %878 = vmatpush3.msra.mxu1 %v628_v5 }
  0x46   : > { %407 = vadd.xlane.f32.xlu0 %v375_v44  ;;  %441 = vadd.xlane.f32.xlu1 %v440_v49 }
  0x47   : > { %862 = vmatprep.subr.mxu0 %v1087_v56  ;;  %879 = vmatprep.subr.mxu1 %v1087_v56 }
  0x48   : > { %863 = vmatpush3.msra.mxu0 %v465_v63  ;;  %880 = vmatpush3.msra.mxu1 %v627_v6 }
  0x49   : > { %864 = vmatprep.subr.mxu0 %v1087_v56  ;;  %881 = vmatprep.subr.mxu1 %v1087_v56 }
  0x4a   : > { %409 = vadd.xlane.f32.xlu0 %v376_v51  ;;  %444 = vadd.xlane.f32.xlu1 %v443_v54  ;;  %v525_v54 = vsub.s32 %v522_v40, %v484_v26 }
  0x4b   : > { %865 = vmatpush3.msra.mxu0 %v464_v0  ;;  %882 = vmatpush3.msra.mxu1 %v626_v7  ;;  %v532_v0 = vsub.s32 %v529_v52, %v484_v26 }
  0x4c   : > { %883 = vmatprep.subr.mxu1 %v1087_v56 }
  0x4d   : > { %884 = vmatpush3.msra.mxu1 %v625_v8 }
  0x4e   : > { %411 = vadd.xlane.f32.xlu0 %v377_v55  ;;  %885 = vmatprep.subr.mxu1 %v1087_v56 }
  0xb7   : > { %v424_v9 = vpop.xlane.xlu1 %423 }
  0xbb   : > { %v398_v10 = vpop.xlane.xlu0 %397  ;;  %v427_v11 = vpop.xlane.xlu1 %426 }
  0xbc   : > { %v446_v27 = vadd.f32 %v424_v9, %v398_v10 }
  0xbe   : > { %v454_v42 = vmul.f32 0.0025, %v446_v27 }
  0xbf   : > { %v400_v12 = vpop.xlane.xlu0 %399  ;;  %v430_v13 = vpop.xlane.xlu1 %429 }
  0xc0   : > { %v447_v22 = vadd.f32 %v427_v11, %v400_v12  ;;  %v486_v57 = vrot.slane %v454_v42, %v485_v41  ;;  %v624_v11 = vld [vmem:[%s1409_s3 + $0x38] sm:$0xff]  ;;  %v623_v12 = vld [vmem:[%s1409_s3 + $0x30] sm:$0xff] }
  0xc1   : > { %886 = vmatpush3.msra.mxu1 %v624_v11 }
  0xc2   : > { %v455_v35 = vmul.f32 0.0025, %v447_v22  ;;  %887 = vmatprep.subr.mxu1 %v1087_v56 }
  0xc3   : > { %v402_v14 = vpop.xlane.xlu0 %401  ;;  %v433_v15 = vpop.xlane.xlu1 %432  ;;  %888 = vmatpush3.msra.mxu1 %v623_v12 }
  0xc4   : > { %v448_v25 = vadd.f32 %v430_v13, %v402_v14  ;;  %v491_v49 = vrot.slane %v455_v35, %v490_v34  ;;  %889 = vmatprep.subr.mxu1 %v1087_v56  ;;  %v622_v13 = vld [vmem:[%s1409_s3 + $0x28] sm:$0xff]  ;;  %v621_v14 = vld [vmem:[%s1409_s3 + $0x20] sm:$0xff] }
  0xc5   : > { %890 = vmatpush3.msra.mxu1 %v622_v13 }
  0xc6   : > { %v456_v39 = vmul.f32 0.0025, %v448_v25  ;;  %v493_v62 = vsel %vm492_vm2, %v491_v49, %v486_v57  ;;  %891 = vmatprep.subr.mxu1 %v1087_v56 }
  0xc7   : > { %v404_v17 = vpop.xlane.xlu0 %403  ;;  %v436_v18 = vpop.xlane.xlu1 %435  ;;  %892 = vmatpush3.msra.mxu1 %v621_v14 }
  0xc8   : > { %v449_v29 = vadd.f32 %v433_v15, %v404_v17  ;;  %v498_v53 = vrot.slane %v456_v39, %v497_v38  ;;  %v620_v15 = vld [vmem:[%s1409_s3 + $0x18] sm:$0xff]  ;;  %893 = vmatprep.subr.mxu1 %v1087_v56  ;;  %v618_v17 = vld [vmem:[%s1409_s3 + $0x8] sm:$0xff] }
  0xc9   : > { %894 = vmatpush3.msra.mxu1 %v620_v15 }
  0xca   : > { %v457_v44 = vmul.f32 0.0025, %v449_v29  ;;  %v500_v2 = vsel %vm499_vm3, %v498_v53, %v493_v62  ;;  %895 = vmatprep.subr.mxu1 %v1087_v56 }
  0xcb   : > { %v406_v20 = vpop.xlane.xlu0 %405  ;;  %v439_v23 = vpop.xlane.xlu1 %438  ;;  %896 = vmatpush3.msra.mxu1 %v619_v16 }
  0xcc   : > { %v450_v31 = vadd.f32 %v436_v18, %v406_v20  ;;  %v505_v58 = vrot.slane %v457_v44, %v504_v43  ;;  %897 = vmatprep.subr.mxu1 %v1087_v56  ;;  %v617_v18 = vld [vmem:[%s1409_s3] sm:$0xff] }
  0xcd   : > { %898 = vmatpush3.msra.mxu1 %v618_v17 }
  0xce   : > { %v458_v46 = vmul.f32 0.0025, %v450_v31  ;;  %v507_v4 = vsel %vm506_vm4, %v505_v58, %v500_v2  ;;  %899 = vmatprep.subr.mxu1 %v1087_v56  ;;  %v633_v56 = vld [vmem:[%s1410_s4] sm:$0x1] }
  0xcf   : > { %v408_v33 = vpop.xlane.xlu0 %407  ;;  %v442_v37 = vpop.xlane.xlu1 %441  ;;  %900 = vmatpush3.msra.mxu1 %v617_v18 }
  0xd0   : > { %v451_v36 = vadd.f32 %v439_v23, %v408_v33  ;;  %v512_v60 = vrot.slane %v458_v46, %v511_v45  ;;  %v614_v23 = vld [vmem:[%s1408_s2] sm:$0x1] }
  0xd2   : > { %v459_v50 = vmul.f32 0.0025, %v451_v36  ;;  %v514_v6 = vsel %vm513_vm5, %v512_v60, %v507_v4 }
  0xd3   : > { %v410_v48 = vpop.xlane.xlu0 %409  ;;  %v445_v55 = vpop.xlane.xlu1 %444 }
  0xd4   : > { %v452_v51 = vadd.f32 %v442_v37, %v410_v48  ;;  %v519_v63 = vrot.slane %v459_v50, %v518_v47 }
  0xd6   : > { %v460_v59 = vmul.f32 0.0025, %v452_v51  ;;  %v521_v7 = vsel %vm520_vm6, %v519_v63, %v514_v6 }
  0xd7   : > { %v412_v61 = vpop.xlane.xlu0 %411 }
  0xd8   : > { %v453_v1 = vadd.f32 %v445_v55, %v412_v61  ;;  %v526_v3 = vrot.slane %v460_v59, %v525_v54 }
  0xda   : > { %v461_v5 = vmul.f32 0.0025, %v453_v1  ;;  %v528_v9 = vsel %vm527_vm7, %v526_v3, %v521_v7 }
  0xdc   : > { %v533_v8 = vrot.slane %v461_v5, %v532_v0 }
  0xde   : > { %v535_v10 = vsel %vm534_vm8, %v533_v8, %v528_v9 }
  0xdf   : > { %867 = vmatmul.mubr.msk.f32.vlgmr.msra.gmra.mxu0 %vm536_vm9, %v535_v10 }
 0x19f   : > { %v605_v20 = vpop.f32.mrf.mxu0 }
 0x1a0   : > { %v609_v21 = vadd.f32 %v605_v20, %v472_v19 }
 0x1a1   : > { %v868_v22 = vpop.f32.mrf.mxu0 }
 0x1a2   : > { %610 = vst [vmem:[#allocation3] sm:$0x1] %v609_v21 }
 0x1a9   : > { %v613_v24 = vld [vmem:[#allocation3] sm:$0x1] }
 0x1aa   : > { %v615_v25 = vadd.f32 %v614_v23, %v613_v24 }
 0x1ac   : > { %v616_v26 = vmax.f32 %v615_v25, 0.0 }
 0x1ae   : > { %902 = vmatmul.mubr.f32.vlgmr.msra.gmra.mxu1 %v616_v26 }
 0x26e   : > { %v700_v27 = vpop.f32.mrf.mxu1 }
 0x26f   : > { %v701_v28 = vadd.f32 %v700_v27, %v633_v56 }
 0x270   : > { %v903_v29 = vpop.f32.mrf.mxu1 }
 0x271   : > { %v819_v30 = vmul.f32 -1.442695, %v701_v28 }
 0x273   : > { %970 = vpow2.f32 %v819_v30 }
 0x280   : > { %v971_v31 = vpop.eup %970 }
 0x281   : > { %v707_v32 = vadd.f32 1.0, %v971_v31 }
 0x283   : > { %972 = vrcp.f32 %v707_v32 }
 0x290   : > { %v973_v33 = vpop.eup %972 }
 0x291   : > { %711 = vst.msk [vmem:[%s269_s12] sm:$0x1] %vm710_vm10, %v973_v33 }
 0x292   : > { %1015 = shalt.err (!%p1012_p6)
}
 0x293   : > { %s1016_s27 = scalar_lea.hbm %s1364_s14, 16  ;;  %s1020_s10 = scalar_lea.hbm %s1411_s5, 32 }
 0x294   : > { %p1017_p7 = scmp.ne.s32.totalorder %s1364_s14, %s1016_s27  ;;  %p1021_p13 = scmp.lt.s32.totalorder %s1364_s14, %s1411_s5 }
 0x295   : > { %p1022_p2 = scmp.lt.s32.totalorder %s1020_s10, %s1016_s27 }
 0x296   : > { %p1018_p10 = pnand %p1017_p7, %p1171_p9 }
 0x297   : > { %p1023_p8 = por %p1022_p2, %p1021_p13 }
 0x298   : > { %p1019_p4 = pneg %p1018_p10 }
 0x29a   : > { %p1024_p12 = pnand %p1023_p8, %p1019_p4 }
 0x29c   : > { %1027 = shalt.err (!%p1024_p12)
}
 0x29d   : > { %906 = dma.vmem_to_hbm [thread:$0]  (%p1171_p9), %s726_s13, 16, %s1364_s14, %s713_s16  }
 0x29e PF: > { %s737_s12 = sand.u32 1, %s1062_s18   ;;  %p1417_p0 = scmp.ge.s32.totalorder %s1082_s23, 2 }
 0x29f   : > { %s738_s15 = scalar_lea.sflag [#allocation6], %s737_s12 }
 0x2a0   : > { %p913_p1 = pnand %p1417_p0, %p1178_p11 }
 0x2a2   : > { %p914_p3 = pneg %p913_p1 }
 0x2a4   : > { %1057 = dma.done.wait (%p914_p3), %s738_s15, 16  }
 0x2a5   : > { %1059 = vsyncadd (%p914_p3), %s738_s15, 4294967280  ;;  %s21_s23 = sadd.s32 1, %s1082_s23   ;;  %s1418_s18 = smov %s1066_s19 }
 0x2a6   : > { %p18_p5 = scmp.ge.s32.totalorder %s21_s23, 4   ;;  %s1419_s19 = smov %s1070_s20 }
 0x2a7   : > { %s1420_s20 = smov %s1176_s7  ;;  %s1421_s21 = smov %s1078_s22 }
 0x2a8   : > { %s1422_s22 = smov %s1424_s26  ;;  %20 = sbr.rel (!%p18_p5) target bundleno = 6 (0x6), region = 102 }
 0x2ad   :  { %742 = vsyncpa [#allocation5], 1 }
 0x2ae   :  { %744 = vsyncpa [#allocation5 + $0x1], 1 }
 0x2af   :  { %745 = vsyncpa [#allocation6], 1 }
 0x2b0   :  { %747 = vsyncpa [#allocation6 + $0x1], 1 }

// kernel: tpu_custom_call.1
= control target key start
LH: loop header
LB: loop body
LE: loop exit
PB: predicated region body
PF: predicated region fallthrough
CT: control target
= control target key end

     0   :  { %10 = vsyncpa [#allocation5], 0  ;;  %s1406_s0 = inlined_call_operand.hbm [shape: f32[2,64,400], index: 0, kind: input, shape index: {}]   ;;  %s1407_s1 = inlined_call_operand.vmem [shape: f32[64,128], index: 1, kind: input, shape index: {}]   ;;  %s1408_s2 = inlined_call_operand.vmem [shape: f32[1,128], index: 2, kind: input, shape index: {}]   ;;  %s1409_s3 = inlined_call_operand.vmem [shape: f32[128,64], index: 3, kind: input, shape index: {}]   ;;  %s1410_s4 = inlined_call_operand.vmem [shape: f32[1,64], index: 4, kind: input, shape index: {}]   ;;  %s1411_s5 = inlined_call_operand.hbm [shape: f32[2,1,64], index: 5, kind: output, shape index: {}]  }
   0x1   :  { %12 = vsyncpa [#allocation5 + $0x1], 0 }
   0x2   :  { %13 = vsyncpa [#allocation6], 0 }
   0x3   :  { %15 = vsyncpa [#allocation6 + $0x1], 0  ;;  %s1120_s18 = smov 0   ;;  %s1122_s19 = smov 0  }
   0x4   :  { %s1124_s20 = smov 0   ;;  %s1126_s21 = smov 0  }
   0x5   :  { %s1128_s22 = smov 0   ;;  %s1130_s23 = smov 0  }
   0x6 LB: > { %s809_s24 = sadd.s32 4294967295, %s1082_s23   ;;  %s810_s25 = sadd.s32 4294967294, %s1082_s23   ;;  %s1082_s23 = sphi %s1130_s23, %s21_s23   ;;  %s1078_s22 = sphi %s1128_s22, %s1422_s22   ;;  %s1074_s21 = sphi %s1126_s21, %s1421_s21   ;;  %s1070_s20 = sphi %s1124_s20, %s1420_s20   ;;  %s1066_s19 = sphi %s1122_s19, %s1419_s19   ;;  %s1062_s18 = sphi %s1120_s18, %s1418_s18  }
   0x7   : > { %s40_s26 = sadd.s32 1, %s1078_s22  ;;  %s51_s27 = sadd.s32 1, %s1070_s20 }
   0x8   : > { %p42_p0 = scmp.ge.s32.totalorder %s40_s26, 2  ;;  %p58_p1 = scmp.ne.s32.totalorder %s1070_s20, %s1066_s19 }
   0x9   : > { %p59_p2 = scmp.eq.s32.totalorder %s1082_s23, 0  ;;  %p64_p3 = scmp.ne.s32.totalorder %s1066_s19, %s1062_s18 }
   0xa   : > { %s1424_s26 = smov (%p42_p0, %s40_s26), 0  ;;  %p65_p5 = scmp.eq.s32.totalorder %s809_s24, 0 }
   0xb   : > { %p1161_p4 = por %p59_p2, %p58_p1  ;;  %s44_s29 = ssub.s32 %s1078_s22, %s1424_s26 }
   0xc   : > { %p172_p6 = scmp.eq.s32.totalorder %s809_s24, 1  ;;  %p49_p7 = scmp.eq.s32.totalorder %s44_s29, 0 }
   0xd   : > { %p1167_p8 = por %p65_p5, %p64_p3  ;;  %p178_p10 = scmp.eq.s32.totalorder %s810_s25, 1 }
   0xe   : > { %p1171_p9 = por %p172_p6, %p58_p1  ;;  %p916_p13 = scmp.lt.s32.totalorder %s1082_s23, 2 }
   0xf   : > { %s1176_s7 = scalar_select %p49_p7, %s1070_s20, %s51_s27  }
  0x10   : > { %p1178_p11 = por %p178_p10, %p64_p3  ;;  %s210_s9 = sand.u32 1, %s1070_s20  }
  0x11   : > { %s813_s10 = sshll.u32 %s210_s9, 8  ;;  %s823_s11 = sshll.u32 %s1078_s22, 12 }
  0x12   : > { %s225_s14 = scalar_lea.hbm %s1406_s0, %s823_s11  ;;  %s214_s15 = scalar_lea.vmem [#allocation4], %s813_s10 }
  0x13   : > { %s226_s16 = sshll.u32 %s214_s15, 4  ;;  %p1191_p0 = pnand %p916_p13, %p1161_p4  ;;  %s227_s16 = int_to_ptr.vmem [resolvable:$true] %s226_s16 }
  0x14   : > { %p816_p1 = scmp.ge.s32.totalorder %s1082_s23, 1  ;;  %s211_s24 = scalar_lea.sflag [#allocation5], %s210_s9 }
  0x15   : > { %p976_p2 = pneg %p1191_p0  ;;  %s987_s25 = scalar_lea.vmem %s227_s16, 4096 }
  0x16   : > { %p988_p3 = scmp.ne.s32.totalorder %s227_s16, %s987_s25  ;;  %s1084_s27 = smov [#allocation4]  }
  0x17   : > { %s992_s29 = sshll.u32 %s1084_s27, 4  ;;  %s993_s29 = int_to_ptr.vmem [resolvable:$false] %s992_s29 }
  0x18   : > { %p990_p5 = pnand %p988_p3, %p976_p2  ;;  %s994_s10 = scalar_lea.vmem %s993_s29, 8192 }
  0x19   : > { %p995_p7 = scmp.lt.s32.totalorder %s227_s16, %s993_s29  ;;  %p996_p10 = scmp.lt.s32.totalorder %s994_s10, %s987_s25 }
  0x1a   : > { %p991_p6 = pneg %p990_p5 }
  0x1b   : > { %p997_p12 = por %p996_p10, %p995_p7 }
  0x1d   : > { %p998_p4 = pnand %p997_p12, %p991_p6 }
  0x1f   : > { %1001 = shalt.err (!%p998_p4)
}
  0x20   : > { %s1085_s28 = smov 512   ;;  %s1086_s9 = smov 32  }
  0x21   : > { %911 = dma.hbm_to_vmem [thread:$0]  (!%p1191_p0), %s225_s14, 4096, %s227_s16, %s211_s24, %s1085_s28, %s1085_s28, %s1086_s9  }
  0x22   : > { %p234_p13 = scmp.lt.s32.totalorder %s1082_s23, 3 }
  0x24   : > { %p235_p2 = pnand %p816_p1, %p234_p13 }
  0x25   : > { %s1204_s11 = sand.u32 (!%p235_p2), 1, %s1066_s19  }
  0x26   : > { %238 = sbr.rel (%p235_p2) target bundleno = 670 (0x29e), region = 40  ;;  %s817_s12 = sshll.u32 (!%p235_p2), %s1204_s11, 8 }
  0x27   : > { %s241_s13 = scalar_lea.sflag (!%p235_p2), [#allocation5], %s1204_s11  ;;  %s1208_s15 = scalar_lea.vmem (!%p235_p2), [#allocation4], %s817_s12 }
  0x2b   : > { %1053 = dma.done.wait (%p1167_p8), %s241_s13, 4096  }
  0x2c   : > { %1055 = vsyncadd (%p1167_p8), %s241_s13, 4294963200  ;;  %vm421_vm0 = vcmask 130048   ;;  %v413_v0 = vld [vmem:[%s1208_s15 + $0x18] sm:$0xff]  ;;  %v290_v1 = vld [vmem:[%s1208_s15] sm:$0xff]  ;;  %v1087_v56 = vmov 0.0   ;;  %vm1088_vm1 = vmmov 0  }
  0x2d   : > { %v322_v2 = vld [vmem:[%s1208_s15 + $0x8] sm:$0xff]  ;;  %v422_v3 = vsel %vm421_vm0, %v413_v0, 0.0  ;;  %v354_v5 = vld [vmem:[%s1208_s15 + $0x10] sm:$0xff]  ;;  %v414_v6 = vld [vmem:[%s1208_s15 + $0x38] sm:$0xff]  ;;  %850 = vmatprep.subr.mxu0 %v1087_v56  ;;  %289 = vst [vmem:[#allocation3] sm:$0x1] %v1087_v56  ;;  %869 = vmatprep.subr.mxu1 %v1087_v56 }
  0x2e   : > { %v338_v4 = vadd.f32 %v322_v2, %v290_v1  ;;  %v291_v7 = vld [vmem:[%s1208_s15 + $0x20] sm:$0xff]  ;;  %423 = vadd.xlane.f32.xlu1 %v422_v3  ;;  %v323_v8 = vld [vmem:[%s1208_s15 + $0x28] sm:$0xff]  ;;  %v355_v9 = vld [vmem:[%s1208_s15 + $0x30] sm:$0xff]  ;;  %v425_v11 = vsel %vm421_vm0, %v414_v6, 0.0  ;;  %866 = vmatprep.mubr.msk.f32.mxu0 %vm1088_vm1, %v1087_v56  ;;  %vm492_vm2 = vcmask 130112   ;;  %vm499_vm3 = vcmask 195712  }
  0x2f   : > { %v339_v12 = vadd.f32 %v323_v8, %v291_v7  ;;  %v292_v13 = vld [vmem:[%s1208_s15 + $0x40] sm:$0xff]  ;;  %v324_v14 = vld [vmem:[%s1208_s15 + $0x48] sm:$0xff]  ;;  %v415_v15 = vld [vmem:[%s1208_s15 + $0x58] sm:$0xff]  ;;  %901 = vmatprep.mubr.msk.f32.mxu1 %vm1088_vm1, %v1087_v56  ;;  %vm506_vm4 = vcmask 261312   ;;  %vm513_vm5 = vcmask 326912   ;;  %vm520_vm6 = vcmask 392512  }
  0x30   : > { %v370_v10 = vadd.f32 %v354_v5, %v338_v4  ;;  %v340_v17 = vadd.f32 %v324_v14, %v292_v13  ;;  %v356_v18 = vld [vmem:[%s1208_s15 + $0x50] sm:$0xff]  ;;  %v293_v19 = vld [vmem:[%s1208_s15 + $0x60] sm:$0xff]  ;;  %v325_v20 = vld [vmem:[%s1208_s15 + $0x68] sm:$0xff]  ;;  %v428_v21 = vsel %vm421_vm0, %v415_v15, 0.0  ;;  %vm527_vm7 = vcmask 458112   ;;  %s820_s9 = sshll.u32 %s1074_s21, 4 }
  0x31   : > { %v371_v16 = vadd.f32 %v355_v9, %v339_v12  ;;  %v416_v22 = vld [vmem:[%s1208_s15 + $0x78] sm:$0xff]  ;;  %v341_v24 = vadd.f32 %v325_v20, %v293_v19  ;;  %v357_v25 = vld [vmem:[%s1208_s15 + $0x70] sm:$0xff]  ;;  %v294_v26 = vld [vmem:[%s1208_s15 + $0x80] sm:$0xff]  ;;  %vm534_vm8 = vcmask 523712   ;;  %vm536_vm9 = vcmask 523264   ;;  %s269_s12 = scalar_lea.vmem [#allocation7], %s1204_s11  ;;  %s1364_s14 = scalar_lea.hbm %s1411_s5, %s820_s9 }
  0x32   : > { %397 = vadd.xlane.f32.xlu0 %v370_v10  ;;  %426 = vadd.xlane.f32.xlu1 %v425_v11  ;;  %v372_v23 = vadd.f32 %v356_v18, %v340_v17  ;;  %v326_v27 = vld [vmem:[%s1208_s15 + $0x88] sm:$0xff]  ;;  %v431_v28 = vsel %vm421_vm0, %v416_v22, 0.0  ;;  %v417_v29 = vld [vmem:[%s1208_s15 + $0x98] sm:$0xff]  ;;  %v358_v32 = vld [vmem:[%s1208_s15 + $0x90] sm:$0xff]  ;;  %s725_s13 = sshll.u32 %s269_s12, 4  ;;  %vm710_vm10 = vcmask 516096   ;;  %s726_s13 = int_to_ptr.vmem [resolvable:$true] %s725_s13 }
  0x33   : > { %v373_v30 = vadd.f32 %v357_v25, %v341_v24  ;;  %v342_v31 = vadd.f32 %v326_v27, %v294_v26  ;;  %v295_v33 = vld [vmem:[%s1208_s15 + $0xa0] sm:$0xff]  ;;  %v327_v34 = vld [vmem:[%s1208_s15 + $0xa8] sm:$0xff]  ;;  %v434_v35 = vsel %vm421_vm0, %v417_v29, 0.0  ;;  %v418_v36 = vld [vmem:[%s1208_s15 + $0xb8] sm:$0xff]  ;;  %s713_s16 = scalar_lea.sflag [#allocation6], %s1204_s11  ;;  %s1002_s17 = scalar_lea.vmem %s726_s13, 16 }
  0x34   : > { %v343_v38 = vadd.f32 %v327_v34, %v295_v33  ;;  %v359_v39 = vld [vmem:[%s1208_s15 + $0xb0] sm:$0xff]  ;;  %v296_v40 = vld [vmem:[%s1208_s15 + $0xc0] sm:$0xff]  ;;  %v328_v41 = vld [vmem:[%s1208_s15 + $0xc8] sm:$0xff]  ;;  %v437_v42 = vsel %vm421_vm0, %v418_v36, 0.0  ;;  %p1003_p8 = scmp.ne.s32.totalorder %s726_s13, %s1002_s17  ;;  %s1089_s24 = smov [#allocation7]  }
  0x35   : > { %v374_v37 = vadd.f32 %v358_v32, %v342_v31  ;;  %v419_v43 = vld [vmem:[%s1208_s15 + $0xd8] sm:$0xff]  ;;  %v344_v45 = vadd.f32 %v328_v41, %v296_v40  ;;  %v360_v46 = vld [vmem:[%s1208_s15 + $0xd0] sm:$0xff]  ;;  %v297_v47 = vld [vmem:[%s1208_s15 + $0xe0] sm:$0xff]  ;;  %s1006_s25 = sshll.u32 %s1089_s24, 4  ;;  %s1007_s25 = int_to_ptr.vmem [resolvable:$false] %s1006_s25 }
  0x36   : > { %399 = vadd.xlane.f32.xlu0 %v371_v16  ;;  %429 = vadd.xlane.f32.xlu1 %v428_v21  ;;  %v375_v44 = vadd.f32 %v359_v39, %v343_v38  ;;  %v329_v48 = vld [vmem:[%s1208_s15 + $0xe8] sm:$0xff]  ;;  %v440_v49 = vsel %vm421_vm0, %v419_v43, 0.0  ;;  %v420_v50 = vld [vmem:[%s1208_s15 + $0xf8] sm:$0xff]  ;;  %v361_v53 = vld [vmem:[%s1208_s15 + $0xf0] sm:$0xff]  ;;  %v481_v16 = vlaneseq  ;;  %p1004_p12 = pnand %p1003_p8, %p1171_p9  ;;  %s1008_s21 = scalar_lea.vmem %s1007_s25, 32 }
  0x37   : > { %v376_v51 = vadd.f32 %v360_v46, %v344_v45  ;;  %v345_v52 = vadd.f32 %v329_v48, %v297_v47  ;;  %v443_v54 = vsel %vm421_vm0, %v420_v50, 0.0  ;;  %v471_v57 = vld [vmem:[%s1407_s1 + $0x38] sm:$0xff]  ;;  %v470_v58 = vld [vmem:[%s1407_s1 + $0x30] sm:$0xff]  ;;  %v469_v59 = vld [vmem:[%s1407_s1 + $0x28] sm:$0xff]  ;;  %p1009_p1 = scmp.lt.s32.totalorder %s726_s13, %s1007_s25  ;;  %p1010_p3 = scmp.lt.s32.totalorder %s1008_s21, %s1002_s17 }
  0x38   : > { %851 = vmatpush3.msra.mxu0 %v471_v57  ;;  %v468_v60 = vld [vmem:[%s1407_s1 + $0x20] sm:$0xff]  ;;  %v467_v61 = vld [vmem:[%s1407_s1 + $0x18] sm:$0xff]  ;;  %v466_v62 = vld [vmem:[%s1407_s1 + $0x10] sm:$0xff]  ;;  %v482_v19 = vand.u32 127, %v481_v16  ;;  %v484_v26 = vshrl.u32 %v481_v16, 7  ;;  %p1005_p0 = pneg %p1004_p12 }
  0x39   : > { %v377_v55 = vadd.f32 %v361_v53, %v345_v52  ;;  %852 = vmatprep.subr.mxu0 %v1087_v56  ;;  %v465_v63 = vld [vmem:[%s1407_s1 + $0x8] sm:$0xff]  ;;  %v464_v0 = vld [vmem:[%s1407_s1] sm:$0xff]  ;;  %v632_v1 = vld [vmem:[%s1409_s3 + $0x78] sm:$0xff]  ;;  %p1011_p5 = por %p1010_p3, %p1009_p1 }
  0x3a   : > { %401 = vadd.xlane.f32.xlu0 %v372_v23  ;;  %432 = vadd.xlane.f32.xlu1 %v431_v28  ;;  %v631_v2 = vld [vmem:[%s1409_s3 + $0x70] sm:$0xff]  ;;  %v630_v3 = vld [vmem:[%s1409_s3 + $0x68] sm:$0xff]  ;;  %v629_v4 = vld [vmem:[%s1409_s3 + $0x60] sm:$0xff]  ;;  %v487_v21 = vadd.s32 4294967288, %v482_v19  ;;  %v494_v24 = vadd.s32 4294967280, %v482_v19  ;;  %v501_v28 = vadd.s32 4294967272, %v482_v19  ;;  %v485_v41 = vsub.s32 %v482_v19, %v484_v26 }
  0x3b   : > { %853 = vmatpush3.msra.mxu0 %v470_v58  ;;  %870 = vmatpush3.msra.mxu1 %v632_v1  ;;  %v628_v5 = vld [vmem:[%s1409_s3 + $0x58] sm:$0xff]  ;;  %v627_v6 = vld [vmem:[%s1409_s3 + $0x50] sm:$0xff]  ;;  %v626_v7 = vld [vmem:[%s1409_s3 + $0x48] sm:$0xff]  ;;  %v515_v32 = vadd.s32 4294967256, %v482_v19  ;;  %v522_v40 = vadd.s32 4294967248, %v482_v19  ;;  %v529_v52 = vadd.s32 4294967240, %v482_v19  ;;  %p1012_p6 = pnand %p1011_p5, %p1005_p0 }
  0x3c   : > { %854 = vmatprep.subr.mxu0 %v1087_v56  ;;  %871 = vmatprep.subr.mxu1 %v1087_v56  ;;  %v625_v8 = vld [vmem:[%s1409_s3 + $0x40] sm:$0xff]  ;;  %v490_v34 = vsub.s32 %v487_v21, %v484_v26  ;;  %v497_v38 = vsub.s32 %v494_v24, %v484_v26  ;;  %v504_v43 = vsub.s32 %v501_v28, %v484_v26  ;;  %v619_v16 = vld [vmem:[%s1409_s3 + $0x10] sm:$0xff] }
  0x3d   : > { %855 = vmatpush3.msra.mxu0 %v469_v59  ;;  %872 = vmatpush3.msra.mxu1 %v631_v2  ;;  %v518_v47 = vsub.s32 %v515_v32, %v484_v26 }
  0x3e   : > { %403 = vadd.xlane.f32.xlu0 %v373_v30  ;;  %435 = vadd.xlane.f32.xlu1 %v434_v35  ;;  %v508_v30 = vadd.s32 4294967264, %v482_v19  ;;  %v472_v19 = vld [vmem:[#allocation3] sm:$0x1] }
  0x3f   : > { %856 = vmatprep.subr.mxu0 %v1087_v56  ;;  %873 = vmatprep.subr.mxu1 %v1087_v56 }
  0x40   : > { %857 = vmatpush3.msra.mxu0 %v468_v60  ;;  %874 = vmatpush3.msra.mxu1 %v630_v3  ;;  %v511_v45 = vsub.s32 %v508_v30, %v484_v26 }
  0x41   : > { %858 = vmatprep.subr.mxu0 %v1087_v56  ;;  %875 = vmatprep.subr.mxu1 %v1087_v56 }
  0x42   : > { %405 = vadd.xlane.f32.xlu0 %v374_v37  ;;  %438 = vadd.xlane.f32.xlu1 %v437_v42 }
  0x43   : > { %859 = vmatpush3.msra.mxu0 %v467_v61  ;;  %876 = vmatpush3.msra.mxu1 %v629_v4 }
  0x44   : > { %860 = vmatprep.subr.mxu0 %v1087_v56  ;;  %877 = vmatprep.subr.mxu1 %v1087_v56 }
  0x45   : > { %861 = vmatpush3.msra.mxu0 %v466_v62  ;;  %878 = vmatpush3.msra.mxu1 %v628_v5 }
  0x46   : > { %407 = vadd.xlane.f32.xlu0 %v375_v44  ;;  %441 = vadd.xlane.f32.xlu1 %v440_v49 }
  0x47   : > { %862 = vmatprep.subr.mxu0 %v1087_v56  ;;  %879 = vmatprep.subr.mxu1 %v1087_v56 }
  0x48   : > { %863 = vmatpush3.msra.mxu0 %v465_v63  ;;  %880 = vmatpush3.msra.mxu1 %v627_v6 }
  0x49   : > { %864 = vmatprep.subr.mxu0 %v1087_v56  ;;  %881 = vmatprep.subr.mxu1 %v1087_v56 }
  0x4a   : > { %409 = vadd.xlane.f32.xlu0 %v376_v51  ;;  %444 = vadd.xlane.f32.xlu1 %v443_v54  ;;  %v525_v54 = vsub.s32 %v522_v40, %v484_v26 }
  0x4b   : > { %865 = vmatpush3.msra.mxu0 %v464_v0  ;;  %882 = vmatpush3.msra.mxu1 %v626_v7  ;;  %v532_v0 = vsub.s32 %v529_v52, %v484_v26 }
  0x4c   : > { %883 = vmatprep.subr.mxu1 %v1087_v56 }
  0x4d   : > { %884 = vmatpush3.msra.mxu1 %v625_v8 }
  0x4e   : > { %411 = vadd.xlane.f32.xlu0 %v377_v55  ;;  %885 = vmatprep.subr.mxu1 %v1087_v56 }
  0xb7   : > { %v424_v9 = vpop.xlane.xlu1 %423 }
  0xbb   : > { %v398_v10 = vpop.xlane.xlu0 %397  ;;  %v427_v11 = vpop.xlane.xlu1 %426 }
  0xbc   : > { %v446_v27 = vadd.f32 %v424_v9, %v398_v10 }
  0xbe   : > { %v454_v42 = vmul.f32 0.0025, %v446_v27 }
  0xbf   : > { %v400_v12 = vpop.xlane.xlu0 %399  ;;  %v430_v13 = vpop.xlane.xlu1 %429 }
  0xc0   : > { %v447_v22 = vadd.f32 %v427_v11, %v400_v12  ;;  %v486_v57 = vrot.slane %v454_v42, %v485_v41  ;;  %v624_v11 = vld [vmem:[%s1409_s3 + $0x38] sm:$0xff]  ;;  %v623_v12 = vld [vmem:[%s1409_s3 + $0x30] sm:$0xff] }
  0xc1   : > { %886 = vmatpush3.msra.mxu1 %v624_v11 }
  0xc2   : > { %v455_v35 = vmul.f32 0.0025, %v447_v22  ;;  %887 = vmatprep.subr.mxu1 %v1087_v56 }
  0xc3   : > { %v402_v14 = vpop.xlane.xlu0 %401  ;;  %v433_v15 = vpop.xlane.xlu1 %432  ;;  %888 = vmatpush3.msra.mxu1 %v623_v12 }
  0xc4   : > { %v448_v25 = vadd.f32 %v430_v13, %v402_v14  ;;  %v491_v49 = vrot.slane %v455_v35, %v490_v34  ;;  %889 = vmatprep.subr.mxu1 %v1087_v56  ;;  %v622_v13 = vld [vmem:[%s1409_s3 + $0x28] sm:$0xff]  ;;  %v621_v14 = vld [vmem:[%s1409_s3 + $0x20] sm:$0xff] }
  0xc5   : > { %890 = vmatpush3.msra.mxu1 %v622_v13 }
  0xc6   : > { %v456_v39 = vmul.f32 0.0025, %v448_v25  ;;  %v493_v62 = vsel %vm492_vm2, %v491_v49, %v486_v57  ;;  %891 = vmatprep.subr.mxu1 %v1087_v56 }
  0xc7   : > { %v404_v17 = vpop.xlane.xlu0 %403  ;;  %v436_v18 = vpop.xlane.xlu1 %435  ;;  %892 = vmatpush3.msra.mxu1 %v621_v14 }
  0xc8   : > { %v449_v29 = vadd.f32 %v433_v15, %v404_v17  ;;  %v498_v53 = vrot.slane %v456_v39, %v497_v38  ;;  %v620_v15 = vld [vmem:[%s1409_s3 + $0x18] sm:$0xff]  ;;  %893 = vmatprep.subr.mxu1 %v1087_v56  ;;  %v618_v17 = vld [vmem:[%s1409_s3 + $0x8] sm:$0xff] }
  0xc9   : > { %894 = vmatpush3.msra.mxu1 %v620_v15 }
  0xca   : > { %v457_v44 = vmul.f32 0.0025, %v449_v29  ;;  %v500_v2 = vsel %vm499_vm3, %v498_v53, %v493_v62  ;;  %895 = vmatprep.subr.mxu1 %v1087_v56 }
  0xcb   : > { %v406_v20 = vpop.xlane.xlu0 %405  ;;  %v439_v23 = vpop.xlane.xlu1 %438  ;;  %896 = vmatpush3.msra.mxu1 %v619_v16 }
  0xcc   : > { %v450_v31 = vadd.f32 %v436_v18, %v406_v20  ;;  %v505_v58 = vrot.slane %v457_v44, %v504_v43  ;;  %897 = vmatprep.subr.mxu1 %v1087_v56  ;;  %v617_v18 = vld [vmem:[%s1409_s3] sm:$0xff] }
  0xcd   : > { %898 = vmatpush3.msra.mxu1 %v618_v17 }
  0xce   : > { %v458_v46 = vmul.f32 0.0025, %v450_v31  ;;  %v507_v4 = vsel %vm506_vm4, %v505_v58, %v500_v2  ;;  %899 = vmatprep.subr.mxu1 %v1087_v56  ;;  %v633_v56 = vld [vmem:[%s1410_s4] sm:$0x1] }
  0xcf   : > { %v408_v33 = vpop.xlane.xlu0 %407  ;;  %v442_v37 = vpop.xlane.xlu1 %441  ;;  %900 = vmatpush3.msra.mxu1 %v617_v18 }
  0xd0   : > { %v451_v36 = vadd.f32 %v439_v23, %v408_v33  ;;  %v512_v60 = vrot.slane %v458_v46, %v511_v45  ;;  %v614_v23 = vld [vmem:[%s1408_s2] sm:$0x1] }
  0xd2   : > { %v459_v50 = vmul.f32 0.0025, %v451_v36  ;;  %v514_v6 = vsel %vm513_vm5, %v512_v60, %v507_v4 }
  0xd3   : > { %v410_v48 = vpop.xlane.xlu0 %409  ;;  %v445_v55 = vpop.xlane.xlu1 %444 }
  0xd4   : > { %v452_v51 = vadd.f32 %v442_v37, %v410_v48  ;;  %v519_v63 = vrot.slane %v459_v50, %v518_v47 }
  0xd6   : > { %v460_v59 = vmul.f32 0.0025, %v452_v51  ;;  %v521_v7 = vsel %vm520_vm6, %v519_v63, %v514_v6 }
  0xd7   : > { %v412_v61 = vpop.xlane.xlu0 %411 }
  0xd8   : > { %v453_v1 = vadd.f32 %v445_v55, %v412_v61  ;;  %v526_v3 = vrot.slane %v460_v59, %v525_v54 }
  0xda   : > { %v461_v5 = vmul.f32 0.0025, %v453_v1  ;;  %v528_v9 = vsel %vm527_vm7, %v526_v3, %v521_v7 }
  0xdc   : > { %v533_v8 = vrot.slane %v461_v5, %v532_v0 }
  0xde   : > { %v535_v10 = vsel %vm534_vm8, %v533_v8, %v528_v9 }
  0xdf   : > { %867 = vmatmul.mubr.msk.f32.vlgmr.msra.gmra.mxu0 %vm536_vm9, %v535_v10 }
 0x19f   : > { %v605_v20 = vpop.f32.mrf.mxu0 }
 0x1a0   : > { %v609_v21 = vadd.f32 %v605_v20, %v472_v19 }
 0x1a1   : > { %v868_v22 = vpop.f32.mrf.mxu0 }
 0x1a2   : > { %610 = vst [vmem:[#allocation3] sm:$0x1] %v609_v21 }
 0x1a9   : > { %v613_v24 = vld [vmem:[#allocation3] sm:$0x1] }
 0x1aa   : > { %v615_v25 = vadd.f32 %v614_v23, %v613_v24 }
 0x1ac   : > { %v616_v26 = vmax.f32 %v615_v25, 0.0 }
 0x1ae   : > { %902 = vmatmul.mubr.f32.vlgmr.msra.gmra.mxu1 %v616_v26 }
 0x26e   : > { %v700_v27 = vpop.f32.mrf.mxu1 }
 0x26f   : > { %v701_v28 = vadd.f32 %v700_v27, %v633_v56 }
 0x270   : > { %v903_v29 = vpop.f32.mrf.mxu1 }
 0x271   : > { %v819_v30 = vmul.f32 -1.442695, %v701_v28 }
 0x273   : > { %970 = vpow2.f32 %v819_v30 }
 0x280   : > { %v971_v31 = vpop.eup %970 }
 0x281   : > { %v707_v32 = vadd.f32 1.0, %v971_v31 }
 0x283   : > { %972 = vrcp.f32 %v707_v32 }
 0x290   : > { %v973_v33 = vpop.eup %972 }
 0x291   : > { %711 = vst.msk [vmem:[%s269_s12] sm:$0x1] %vm710_vm10, %v973_v33 }
 0x292   : > { %1015 = shalt.err (!%p1012_p6)
}
 0x293   : > { %s1016_s27 = scalar_lea.hbm %s1364_s14, 16  ;;  %s1020_s10 = scalar_lea.hbm %s1411_s5, 32 }
 0x294   : > { %p1017_p7 = scmp.ne.s32.totalorder %s1364_s14, %s1016_s27  ;;  %p1021_p13 = scmp.lt.s32.totalorder %s1364_s14, %s1411_s5 }
 0x295   : > { %p1022_p2 = scmp.lt.s32.totalorder %s1020_s10, %s1016_s27 }
 0x296   : > { %p1018_p10 = pnand %p1017_p7, %p1171_p9 }
 0x297   : > { %p1023_p8 = por %p1022_p2, %p1021_p13 }
 0x298   : > { %p1019_p4 = pneg %p1018_p10 }
 0x29a   : > { %p1024_p12 = pnand %p1023_p8, %p1019_p4 }
 0x29c   : > { %1027 = shalt.err (!%p1024_p12)
}
 0x29d   : > { %906 = dma.vmem_to_hbm [thread:$0]  (%p1171_p9), %s726_s13, 16, %s1364_s14, %s713_s16  }
 0x29e PF: > { %s737_s12 = sand.u32 1, %s1062_s18   ;;  %p1417_p0 = scmp.ge.s32.totalorder %s1082_s23, 2 }
 0x29f   : > { %s738_s15 = scalar_lea.sflag [#allocation6], %s737_s12 }
 0x2a0   : > { %p913_p1 = pnand %p1417_p0, %p1178_p11 }
 0x2a2   : > { %p914_p3 = pneg %p913_p1 }
 0x2a4   : > { %1057 = dma.done.wait (%p914_p3), %s738_s15, 16  }
 0x2a5   : > { %1059 = vsyncadd (%p914_p3), %s738_s15, 4294967280  ;;  %s21_s23 = sadd.s32 1, %s1082_s23   ;;  %s1418_s18 = smov %s1066_s19 }
 0x2a6   : > { %p18_p5 = scmp.ge.s32.totalorder %s21_s23, 4   ;;  %s1419_s19 = smov %s1070_s20 }
 0x2a7   : > { %s1420_s20 = smov %s1176_s7  ;;  %s1421_s21 = smov %s1078_s22 }
 0x2a8   : > { %s1422_s22 = smov %s1424_s26  ;;  %20 = sbr.rel (!%p18_p5) target bundleno = 6 (0x6), region = 102 }
 0x2ad   :  { %742 = vsyncpa [#allocation5], 1 }
 0x2ae   :  { %744 = vsyncpa [#allocation5 + $0x1], 1 }
 0x2af   :  { %745 = vsyncpa [#allocation6], 1 }
 0x2b0   :  { %747 = vsyncpa [#allocation6 + $0x1], 1 }

</bundles_post_ra>
